<compile_context>
chip_gen: v5e
topology: v5e:2x2
jax: 0.10.0
libtpu: 0.0.40
codegen_flags: <defaults>
</compile_context>

<pallas_src>
import functools

import jax
import jax.numpy as jnp
import numpy as np
from jax.experimental import pallas as pl
from jax.experimental.pallas import tpu as pltpu


def _rmsnorm(y, w, eps=1e-6):
    ms = jnp.mean(y * y, axis=-1, keepdims=True)
    return w * (y * jax.lax.rsqrt(ms + eps))


def transformer_block_kernel(
    x_ref, wqkv_ref, bqkv_ref, wo_ref, vecs_ref, w1_ref, b1_ref, w2_ref, out_ref,
    *, num_heads, batch_heads,
):
    bt, S, D = x_ref.shape
    H = num_heads
    hd = D // H
    R = bt * S
    scale = 1.0 / float(hd) ** 0.5
    f32, bf16 = jnp.float32, jnp.bfloat16

    x = x_ref[...].reshape(R, D)            # leading-dim merge only (cheap)
    xb = x.astype(bf16)                     # bf16 MXU operands, f32 accumulation

    vecs = vecs_ref[...]                    # (8, D) f32 packed small vectors
    bo, b2 = vecs[0:1], vecs[1:2]
    attn_nw, ffn_nw = vecs[2:3], vecs[3:4]

    # --- fused QKV projection: ONE (R, D) x (D, 3D) matmul + one bias add -----------
    qkv = jnp.dot(xb, wqkv_ref[...], preferred_element_type=f32) + bqkv_ref[...]
    q = qkv[:, 0 * D:1 * D] * scale         # fold 1/sqrt(hd) into q (f32)
    k = qkv[:, 1 * D:2 * D]
    v = qkv[:, 2 * D:3 * D]

    def softmax_ctx(qh, kh, vh):
        # qh/kh/vh: (batch, S, hd) f32 -> context (batch, S, hd) f32
        s = jnp.einsum("bqd,bkd->bqk", qh.astype(bf16), kh.astype(bf16),
                       preferred_element_type=f32)
        s = s - jnp.max(s, axis=-1, keepdims=True)
        p = jnp.exp(s)
        p = p * pl.reciprocal(jnp.sum(p, axis=-1, keepdims=True), approx=True)
        return jnp.einsum("bqk,bkd->bqd", p.astype(bf16), vh.astype(bf16),
                          preferred_element_type=f32)

    if batch_heads:
        # All heads in TWO einsums: one-time relayout (R, D) -> (bt*H, S, hd).
        def to_heads(t):
            return t.reshape(bt, S, H, hd).transpose(0, 2, 1, 3).reshape(bt * H, S, hd)

        ctx = softmax_ctx(to_heads(q), to_heads(k), to_heads(v))     # (bt*H, S, hd)
        ctx = ctx.reshape(bt, H, S, hd).transpose(0, 2, 1, 3).reshape(R, D)
    else:
        # Fallback: per-head lane slices (no 4-D transposes), same math.
        parts = []
        for h in range(H):                   # static unroll, H is small
            sl = slice(h * hd, (h + 1) * hd)
            c = softmax_ctx(q[:, sl].reshape(bt, S, hd),
                            k[:, sl].reshape(bt, S, hd),
                            v[:, sl].reshape(bt, S, hd))
            parts.append(c.reshape(R, hd))
        ctx = jnp.concatenate(parts, axis=-1)                        # (R, D)

    # --- fused output projection: ONE (R, D) x (D, D) matmul ------------------------
    attn = jnp.dot(ctx.astype(bf16), wo_ref[...], preferred_element_type=f32) + bo

    # residual 1: h = x + RMSNorm(attn(x))        (dropout == identity)
    h1 = x + _rmsnorm(attn, attn_nw)

    # --- feed-forward: linear1 -> SiLU -> linear2 -----------------------------------
    f = jnp.dot(h1.astype(bf16), w1_ref[...], preferred_element_type=f32) + b1_ref[...]
    f = f * jax.nn.sigmoid(f)
    f = jnp.dot(f.astype(bf16), w2_ref[...], preferred_element_type=f32) + b2

    # residual 2: out = h + RMSNorm(ffn(h))       (dropout == identity)
    out = h1 + _rmsnorm(f, ffn_nw)
    out_ref[...] = out.reshape(bt, S, D).astype(out_ref.dtype)


def transformer_block(x, params, num_heads, *, batch_heads=True):
    B, S, D = x.shape
    F = params["w1"].shape[1]
    H = num_heads
    assert D % H == 0, "d_model must be divisible by n_heads"
    f32, bf16 = jnp.float32, jnp.bfloat16

    # Batch tiling: guarantee >= 2 'parallel' grid steps when B >= 2 (v7x has 2 TCs),
    # while still targeting >= 128 rows per step when B is large.
    if B >= 2:
        bt = max(1, min(B // 2, max(1, 128 // S)))
    else:
        bt = 1
    while B % bt:
        bt -= 1
    grid = (B // bt,)

    # --- wrapper-side (trace-time) weight packing & precision prep ------------------
    wqkv = jnp.concatenate([params["wq"], params["wk"], params["wv"]],
                           axis=1).astype(bf16)                         # (D, 3D)
    bqkv = jnp.concatenate([params["bq"], params["bk"], params["bv"]]
                           ).reshape(1, 3 * D).astype(f32)              # (1, 3D)
    wo = params["wo"].astype(bf16)                                      # (D, D)
    w1 = params["w1"].astype(bf16)                                      # (D, F)
    w2 = params["w2"].astype(bf16)                                      # (F, D)
    b1 = params["b1"].reshape(1, F).astype(f32)                         # (1, F)
    vecs = jnp.zeros((8, D), f32)                                       # packed small vectors
    vecs = vecs.at[0].set(params["bo"]).at[1].set(params["b2"])
    vecs = vecs.at[2].set(params["attn_nw"]).at[3].set(params["ffn_nw"])

    # --- specs -----------------------------------------------------------------------
    def rep(shape):
        n = len(shape)
        return pl.BlockSpec(shape, lambda i, _n=n: (0,) * _n)

    in_specs = [
        pl.BlockSpec((bt, S, D), lambda i: (i, 0, 0)),      # x
        rep(wqkv.shape), rep(bqkv.shape), rep(wo.shape),
        rep(vecs.shape), rep(w1.shape), rep(b1.shape), rep(w2.shape),
    ]
    out_spec = pl.BlockSpec((bt, S, D), lambda i: (i, 0, 0))
    out_shape = jax.ShapeDtypeStruct((B, S, D), x.dtype)

    flops = 2 * B * S * (4 * D * D + 2 * S * D + 2 * D * F)
    transcendentals = B * S * (H * S + F + H + 2)
    bytes_accessed = (2 * B * S * D + bqkv.size + vecs.size + b1.size) * 4 \
        + (wqkv.size + wo.size + w1.size + w2.size) * 2
    cost = pl.CostEstimate(flops=int(flops), transcendentals=int(transcendentals),
                           bytes_accessed=int(bytes_accessed))

    kernel = functools.partial(transformer_block_kernel,
                               num_heads=H, batch_heads=batch_heads)
    return pl.pallas_call(
        kernel,
        out_shape=out_shape,
        grid=grid,
        in_specs=in_specs,
        out_specs=out_spec,
        compiler_params=pltpu.CompilerParams(
            dimension_semantics=("parallel",),
            vmem_limit_bytes=48 * 1024 * 1024),
        cost_estimate=cost,
    )(x, wqkv, bqkv, wo, vecs, w1, b1, w2)


def reference_block(x, p, num_heads):
    """Pure-JAX reference with the same bf16-operand / f32-accumulate matmul policy."""
    B, S, D = x.shape
    H, hd = num_heads, D // num_heads
    bf16 = jnp.bfloat16
    mm = lambda a, b: jnp.dot(a.astype(bf16), b.astype(bf16),
                              preferred_element_type=jnp.float32)
    x2 = x.reshape(B * S, D)
    q = (mm(x2, p["wq"]) + p["bq"]).reshape(B, S, H, hd).transpose(0, 2, 1, 3)
    k = (mm(x2, p["wk"]) + p["bk"]).reshape(B, S, H, hd).transpose(0, 2, 1, 3)
    v = (mm(x2, p["wv"]) + p["bv"]).reshape(B, S, H, hd).transpose(0, 2, 1, 3)
    s = jnp.einsum("bhqd,bhkd->bhqk", (q / hd**0.5).astype(bf16), k.astype(bf16),
                   preferred_element_type=jnp.float32)
    a = jax.nn.softmax(s, axis=-1)
    o = jnp.einsum("bhqk,bhkd->bhqd", a.astype(bf16), v.astype(bf16),
                   preferred_element_type=jnp.float32)
    o = o.transpose(0, 2, 1, 3).reshape(B * S, D)
    o = mm(o, p["wo"]) + p["bo"]

    def rms(y, w, eps=1e-6):
        return w * (y * jax.lax.rsqrt(jnp.mean(y * y, -1, keepdims=True) + eps))

    h = x2 + rms(o, p["attn_nw"])
    f = mm(h, p["w1"]) + p["b1"]
    f = f * jax.nn.sigmoid(f)
    f = mm(f, p["w2"]) + p["b2"]
    return (h + rms(f, p["ffn_nw"])).reshape(B, S, D)


if __name__ == "__main__":
    # args: d_model=32, n_heads=4, d_ff=64, dropout=0.1 (-> identity at inference)
    B, S, D, H, F = 2, 8, 32, 4, 64

    key = jax.random.PRNGKey(0)
    keys = jax.random.split(key, 8)
    init = lambda k, shape: (0.02 * jax.random.normal(k, shape)).astype(jnp.float32)

    params = {
        "wq": init(keys[0], (D, D)), "bq": jnp.zeros((D,), jnp.float32),
        "wk": init(keys[1], (D, D)), "bk": jnp.zeros((D,), jnp.float32),
        "wv": init(keys[2], (D, D)), "bv": jnp.zeros((D,), jnp.float32),
        "wo": init(keys[3], (D, D)), "bo": jnp.full((D,), 0.01, jnp.float32),
        "attn_nw": jnp.ones((D,), jnp.float32),
        "w1": init(keys[4], (D, F)), "b1": jnp.full((F,), 0.01, jnp.float32),
        "w2": init(keys[5], (F, D)), "b2": jnp.full((D,), 0.01, jnp.float32),
        "ffn_nw": jnp.ones((D,), jnp.float32),
    }

    x = jax.random.normal(keys[6], (B, S, D), dtype=jnp.float32)

    try:
        out = jax.block_until_ready(
            transformer_block(x, params, num_heads=H, batch_heads=True))
    except Exception:
        # TODO(synk): if this Mosaic build rejects the tiny-shape (bt,S,H,hd) head
        # transpose, retry with per-head lane-slice einsums (identical math).
        out = jax.block_until_ready(
            transformer_block(x, params, num_heads=H, batch_heads=False))

    ref = jax.block_until_ready(reference_block(x, params, H))
    # Tolerance covers bf16 matmul operands (matched in the reference) plus the
    # approx-reciprocal softmax denominator used only in the kernel.
    np.testing.assert_allclose(np.asarray(out), np.asarray(ref), rtol=1e-2, atol=1e-2)

    print("KERNEL_OK")
</pallas_src>

<mosaic_0001>
module attributes {stable_mosaic.version = 11 : i64} {
  func.func @transformer_block_kernel(%arg0: i32, %arg1: memref<1x8x32xf32, #tpu.memory_space<vmem>>, %arg2: memref<32x96xbf16, #tpu.memory_space<vmem>>, %arg3: memref<1x96xf32, #tpu.memory_space<vmem>>, %arg4: memref<32x32xbf16, #tpu.memory_space<vmem>>, %arg5: memref<8x32xf32, #tpu.memory_space<vmem>>, %arg6: memref<32x64xbf16, #tpu.memory_space<vmem>>, %arg7: memref<1x64xf32, #tpu.memory_space<vmem>>, %arg8: memref<64x32xbf16, #tpu.memory_space<vmem>>, %arg9: memref<1x8x32xf32, #tpu.memory_space<vmem>>) attributes {dimension_semantics = [#tpu.dimension_semantics<parallel>], iteration_bounds = array<i64: 2>, scalar_prefetch = 0 : i64, scratch_operands = 0 : i64, tpu.core_type = #tpu.core_type<tc>, window_params = [{transform_indices = @transform_0, window_bounds = array<i64: 1, 8, 32>}, {pipeline_mode = #tpu.pipeline_mode<synchronous>, transform_indices = @transform_1, window_bounds = array<i64: 32, 96>}, {pipeline_mode = #tpu.pipeline_mode<synchronous>, transform_indices = @transform_2, window_bounds = array<i64: 1, 96>}, {pipeline_mode = #tpu.pipeline_mode<synchronous>, transform_indices = @transform_3, window_bounds = array<i64: 32, 32>}, {pipeline_mode = #tpu.pipeline_mode<synchronous>, transform_indices = @transform_4, window_bounds = array<i64: 8, 32>}, {pipeline_mode = #tpu.pipeline_mode<synchronous>, transform_indices = @transform_5, window_bounds = array<i64: 32, 64>}, {pipeline_mode = #tpu.pipeline_mode<synchronous>, transform_indices = @transform_6, window_bounds = array<i64: 1, 64>}, {pipeline_mode = #tpu.pipeline_mode<synchronous>, transform_indices = @transform_7, window_bounds = array<i64: 64, 32>}, {transform_indices = @transform_8, window_bounds = array<i64: 1, 8, 32>}]} {
    %c0 = arith.constant 0 : index
    %c0_0 = arith.constant 0 : index
    %c0_1 = arith.constant 0 : index
    %0 = vector.load %arg1[%c0, %c0_0, %c0_1] : memref<1x8x32xf32, #tpu.memory_space<vmem>>, vector<1x8x32xf32>
    %1 = vector.shape_cast %0 : vector<1x8x32xf32> to vector<8x32xf32>
    %2 = arith.truncf %1 : vector<8x32xf32> to vector<8x32xbf16>
    %c0_2 = arith.constant 0 : index
    %c0_3 = arith.constant 0 : index
    %3 = vector.load %arg5[%c0_2, %c0_3] : memref<8x32xf32, #tpu.memory_space<vmem>>, vector<8x32xf32>
    %4 = vector.extract_strided_slice %3 {offsets = [0, 0], sizes = [1, 32], strides = [1, 1]} : vector<8x32xf32> to vector<1x32xf32>
    %5 = vector.extract_strided_slice %3 {offsets = [1, 0], sizes = [1, 32], strides = [1, 1]} : vector<8x32xf32> to vector<1x32xf32>
    %6 = vector.extract_strided_slice %3 {offsets = [2, 0], sizes = [1, 32], strides = [1, 1]} : vector<8x32xf32> to vector<1x32xf32>
    %7 = vector.extract_strided_slice %3 {offsets = [3, 0], sizes = [1, 32], strides = [1, 1]} : vector<8x32xf32> to vector<1x32xf32>
    %c0_4 = arith.constant 0 : index
    %c0_5 = arith.constant 0 : index
    %8 = vector.load %arg2[%c0_4, %c0_5] : memref<32x96xbf16, #tpu.memory_space<vmem>>, vector<32x96xbf16>
    %cst = arith.constant dense<0.000000e+00> : vector<8x96xf32>
    %9 = tpu.matmul %2, %8, %cst {dimension_numbers = #tpu.dot_dimension_numbers<[1], [0], [0], [1], [0, 0, 1, 1], [], []>} : vector<8x32xbf16>, vector<32x96xbf16>, vector<8x96xf32> -> vector<8x96xf32>
    %c0_6 = arith.constant 0 : index
    %c0_7 = arith.constant 0 : index
    %10 = vector.load %arg3[%c0_6, %c0_7] : memref<1x96xf32, #tpu.memory_space<vmem>>, vector<1x96xf32>
    %11 = vector.broadcast %10 : vector<1x96xf32> to vector<8x96xf32>
    %12 = arith.addf %9, %11 : vector<8x96xf32>
    %13 = vector.extract_strided_slice %12 {offsets = [0, 0], sizes = [8, 32], strides = [1, 1]} : vector<8x96xf32> to vector<8x32xf32>
    %cst_8 = arith.constant 0.353553385 : f32
    %14 = vector.broadcast %cst_8 : f32 to vector<8x32xf32>
    %15 = arith.mulf %13, %14 : vector<8x32xf32>
    %16 = vector.extract_strided_slice %12 {offsets = [0, 32], sizes = [8, 32], strides = [1, 1]} : vector<8x96xf32> to vector<8x32xf32>
    %17 = vector.extract_strided_slice %12 {offsets = [0, 64], sizes = [8, 32], strides = [1, 1]} : vector<8x96xf32> to vector<8x32xf32>
    %18 = vector.shape_cast %15 : vector<8x32xf32> to vector<1x8x4x8xf32>
    %19 = tpu.transpose %18, [0, 2, 1, 3] : vector<1x8x4x8xf32> -> vector<1x4x8x8xf32>
    %20 = vector.shape_cast %19 : vector<1x4x8x8xf32> to vector<4x8x8xf32>
    %21 = vector.shape_cast %16 : vector<8x32xf32> to vector<1x8x4x8xf32>
    %22 = tpu.transpose %21, [0, 2, 1, 3] : vector<1x8x4x8xf32> -> vector<1x4x8x8xf32>
    %23 = vector.shape_cast %22 : vector<1x4x8x8xf32> to vector<4x8x8xf32>
    %24 = vector.shape_cast %17 : vector<8x32xf32> to vector<1x8x4x8xf32>
    %25 = tpu.transpose %24, [0, 2, 1, 3] : vector<1x8x4x8xf32> -> vector<1x4x8x8xf32>
    %26 = vector.shape_cast %25 : vector<1x4x8x8xf32> to vector<4x8x8xf32>
    %27 = arith.truncf %20 : vector<4x8x8xf32> to vector<4x8x8xbf16>
    %28 = arith.truncf %23 : vector<4x8x8xf32> to vector<4x8x8xbf16>
    "tpu.trace_start"() <{level = 10 : i32, message = "bqd,bkd->bqk"}> : () -> ()
    %cst_9 = arith.constant dense<0.000000e+00> : vector<4x8x8xf32>
    %29 = tpu.matmul %27, %28, %cst_9 {dimension_numbers = #tpu.dot_dimension_numbers<[2], [2], [1], [1], [0, 0, 0, 1, 1, 1], [0], [0]>} : vector<4x8x8xbf16>, vector<4x8x8xbf16>, vector<4x8x8xf32> -> vector<4x8x8xf32>
    "tpu.trace_stop"() : () -> ()
    %cst_10 = arith.constant dense<0xFF800000> : vector<4x8xf32>
    %30 = vector.multi_reduction <maximumf>, %29, %cst_10 [2] : vector<4x8x8xf32> to vector<4x8xf32>
    %31 = vector.shape_cast %30 : vector<4x8xf32> to vector<4x8x1xf32>
    %32 = vector.broadcast %31 : vector<4x8x1xf32> to vector<4x8x8xf32>
    %33 = arith.subf %29, %32 : vector<4x8x8xf32>
    %34 = math.exp %33 : vector<4x8x8xf32>
    %cst_11 = arith.constant dense<0.000000e+00> : vector<4x8xf32>
    %35 = vector.multi_reduction <add>, %34, %cst_11 [2] : vector<4x8x8xf32> to vector<4x8xf32>
    %36 = vector.shape_cast %35 : vector<4x8xf32> to vector<4x8x1xf32>
    %37 = tpu.reciprocal %36 {approx = true} : vector<4x8x1xf32> -> vector<4x8x1xf32>
    %38 = vector.broadcast %37 : vector<4x8x1xf32> to vector<4x8x8xf32>
    %39 = arith.mulf %34, %38 : vector<4x8x8xf32>
    %40 = arith.truncf %39 : vector<4x8x8xf32> to vector<4x8x8xbf16>
    %41 = arith.truncf %26 : vector<4x8x8xf32> to vector<4x8x8xbf16>
    "tpu.trace_start"() <{level = 10 : i32, message = "bqk,bkd->bqd"}> : () -> ()
    %cst_12 = arith.constant dense<0.000000e+00> : vector<4x8x8xf32>
    %42 = tpu.matmul %40, %41, %cst_12 {dimension_numbers = #tpu.dot_dimension_numbers<[2], [1], [1], [2], [0, 0, 0, 1, 1, 2], [0], [0]>} : vector<4x8x8xbf16>, vector<4x8x8xbf16>, vector<4x8x8xf32> -> vector<4x8x8xf32>
    "tpu.trace_stop"() : () -> ()
    %43 = vector.shape_cast %42 : vector<4x8x8xf32> to vector<1x4x8x8xf32>
    %44 = tpu.transpose %43, [0, 2, 1, 3] : vector<1x4x8x8xf32> -> vector<1x8x4x8xf32>
    %45 = vector.shape_cast %44 : vector<1x8x4x8xf32> to vector<8x32xf32>
    %46 = arith.truncf %45 : vector<8x32xf32> to vector<8x32xbf16>
    %c0_13 = arith.constant 0 : index
    %c0_14 = arith.constant 0 : index
    %47 = vector.load %arg4[%c0_13, %c0_14] : memref<32x32xbf16, #tpu.memory_space<vmem>>, vector<32x32xbf16>
    %cst_15 = arith.constant dense<0.000000e+00> : vector<8x32xf32>
    %48 = tpu.matmul %46, %47, %cst_15 {dimension_numbers = #tpu.dot_dimension_numbers<[1], [0], [0], [1], [0, 0, 1, 1], [], []>} : vector<8x32xbf16>, vector<32x32xbf16>, vector<8x32xf32> -> vector<8x32xf32>
    %49 = vector.broadcast %4 : vector<1x32xf32> to vector<8x32xf32>
    %50 = arith.addf %48, %49 : vector<8x32xf32>
    %51 = arith.mulf %50, %50 : vector<8x32xf32>
    %cst_16 = arith.constant dense<0.000000e+00> : vector<8xf32>
    %52 = vector.multi_reduction <add>, %51, %cst_16 [1] : vector<8x32xf32> to vector<8xf32>
    %53 = vector.shape_cast %52 : vector<8xf32> to vector<8x1xf32>
    %cst_17 = arith.constant 3.200000e+01 : f32
    %54 = vector.broadcast %cst_17 : f32 to vector<8x1xf32>
    %55 = arith.divf %53, %54 : vector<8x1xf32>
    %cst_18 = arith.constant 9.99999997E-7 : f32
    %56 = vector.broadcast %cst_18 : f32 to vector<8x1xf32>
    %57 = arith.addf %55, %56 : vector<8x1xf32>
    %58 = math.rsqrt %57 : vector<8x1xf32>
    %59 = vector.broadcast %58 : vector<8x1xf32> to vector<8x32xf32>
    %60 = arith.mulf %50, %59 : vector<8x32xf32>
    %61 = vector.broadcast %6 : vector<1x32xf32> to vector<8x32xf32>
    %62 = arith.mulf %61, %60 : vector<8x32xf32>
    %63 = arith.addf %1, %62 : vector<8x32xf32>
    %64 = arith.truncf %63 : vector<8x32xf32> to vector<8x32xbf16>
    %c0_19 = arith.constant 0 : index
    %c0_20 = arith.constant 0 : index
    %65 = vector.load %arg6[%c0_19, %c0_20] : memref<32x64xbf16, #tpu.memory_space<vmem>>, vector<32x64xbf16>
    %cst_21 = arith.constant dense<0.000000e+00> : vector<8x64xf32>
    %66 = tpu.matmul %64, %65, %cst_21 {dimension_numbers = #tpu.dot_dimension_numbers<[1], [0], [0], [1], [0, 0, 1, 1], [], []>} : vector<8x32xbf16>, vector<32x64xbf16>, vector<8x64xf32> -> vector<8x64xf32>
    %c0_22 = arith.constant 0 : index
    %c0_23 = arith.constant 0 : index
    %67 = vector.load %arg7[%c0_22, %c0_23] : memref<1x64xf32, #tpu.memory_space<vmem>>, vector<1x64xf32>
    %68 = vector.broadcast %67 : vector<1x64xf32> to vector<8x64xf32>
    %69 = arith.addf %66, %68 : vector<8x64xf32>
    %70 = arith.negf %69 : vector<8x64xf32>
    %71 = math.exp %70 : vector<8x64xf32>
    %cst_24 = arith.constant 1.000000e+00 : f32
    %72 = vector.broadcast %cst_24 : f32 to vector<8x64xf32>
    %73 = arith.addf %72, %71 : vector<8x64xf32>
    %74 = arith.divf %72, %73 : vector<8x64xf32>
    %75 = arith.mulf %69, %74 : vector<8x64xf32>
    %76 = arith.truncf %75 : vector<8x64xf32> to vector<8x64xbf16>
    %c0_25 = arith.constant 0 : index
    %c0_26 = arith.constant 0 : index
    %77 = vector.load %arg8[%c0_25, %c0_26] : memref<64x32xbf16, #tpu.memory_space<vmem>>, vector<64x32xbf16>
    %cst_27 = arith.constant dense<0.000000e+00> : vector<8x32xf32>
    %78 = tpu.matmul %76, %77, %cst_27 {dimension_numbers = #tpu.dot_dimension_numbers<[1], [0], [0], [1], [0, 0, 1, 1], [], []>} : vector<8x64xbf16>, vector<64x32xbf16>, vector<8x32xf32> -> vector<8x32xf32>
    %79 = vector.broadcast %5 : vector<1x32xf32> to vector<8x32xf32>
    %80 = arith.addf %78, %79 : vector<8x32xf32>
    %81 = arith.mulf %80, %80 : vector<8x32xf32>
    %cst_28 = arith.constant dense<0.000000e+00> : vector<8xf32>
    %82 = vector.multi_reduction <add>, %81, %cst_28 [1] : vector<8x32xf32> to vector<8xf32>
    %83 = vector.shape_cast %82 : vector<8xf32> to vector<8x1xf32>
    %cst_29 = arith.constant 3.200000e+01 : f32
    %84 = vector.broadcast %cst_29 : f32 to vector<8x1xf32>
    %85 = arith.divf %83, %84 : vector<8x1xf32>
    %cst_30 = arith.constant 9.99999997E-7 : f32
    %86 = vector.broadcast %cst_30 : f32 to vector<8x1xf32>
    %87 = arith.addf %85, %86 : vector<8x1xf32>
    %88 = math.rsqrt %87 : vector<8x1xf32>
    %89 = vector.broadcast %88 : vector<8x1xf32> to vector<8x32xf32>
    %90 = arith.mulf %80, %89 : vector<8x32xf32>
    %91 = vector.broadcast %7 : vector<1x32xf32> to vector<8x32xf32>
    %92 = arith.mulf %91, %90 : vector<8x32xf32>
    %93 = arith.addf %63, %92 : vector<8x32xf32>
    %94 = vector.shape_cast %93 : vector<8x32xf32> to vector<1x8x32xf32>
    %c0_31 = arith.constant 0 : index
    %c0_32 = arith.constant 0 : index
    %c0_33 = arith.constant 0 : index
    %95 = vector.load %arg9[%c0_31, %c0_32, %c0_33] : memref<1x8x32xf32, #tpu.memory_space<vmem>>, vector<1x8x32xf32>
    tpu.vector_store %arg9[%c0_31, %c0_32, %c0_33], %94 {strides = array<i32>} : memref<1x8x32xf32, #tpu.memory_space<vmem>>, vector<1x8x32xf32>,
    return
  }
  func.func @transform_0(%arg0: i32) -> (i32, i32, i32) {
    %c0_i32 = arith.constant 0 : i32
    %c0_i32_0 = arith.constant 0 : i32
    %c0_i32_1 = arith.constant 0 : i32
    return %arg0, %c0_i32, %c0_i32_0 : i32, i32, i32
  }
  func.func @transform_1(%arg0: i32) -> (i32, i32) {
    %c0_i32 = arith.constant 0 : i32
    %c0_i32_0 = arith.constant 0 : i32
    %c0_i32_1 = arith.constant 0 : i32
    return %c0_i32, %c0_i32_0 : i32, i32
  }
  func.func @transform_2(%arg0: i32) -> (i32, i32) {
    %c0_i32 = arith.constant 0 : i32
    %c0_i32_0 = arith.constant 0 : i32
    %c0_i32_1 = arith.constant 0 : i32
    return %c0_i32, %c0_i32_0 : i32, i32
  }
  func.func @transform_3(%arg0: i32) -> (i32, i32) {
    %c0_i32 = arith.constant 0 : i32
    %c0_i32_0 = arith.constant 0 : i32
    %c0_i32_1 = arith.constant 0 : i32
    return %c0_i32, %c0_i32_0 : i32, i32
  }
  func.func @transform_4(%arg0: i32) -> (i32, i32) {
    %c0_i32 = arith.constant 0 : i32
    %c0_i32_0 = arith.constant 0 : i32
    %c0_i32_1 = arith.constant 0 : i32
    return %c0_i32, %c0_i32_0 : i32, i32
  }
  func.func @transform_5(%arg0: i32) -> (i32, i32) {
    %c0_i32 = arith.constant 0 : i32
    %c0_i32_0 = arith.constant 0 : i32
    %c0_i32_1 = arith.constant 0 : i32
    return %c0_i32, %c0_i32_0 : i32, i32
  }
  func.func @transform_6(%arg0: i32) -> (i32, i32) {
    %c0_i32 = arith.constant 0 : i32
    %c0_i32_0 = arith.constant 0 : i32
    %c0_i32_1 = arith.constant 0 : i32
    return %c0_i32, %c0_i32_0 : i32, i32
  }
  func.func @transform_7(%arg0: i32) -> (i32, i32) {
    %c0_i32 = arith.constant 0 : i32
    %c0_i32_0 = arith.constant 0 : i32
    %c0_i32_1 = arith.constant 0 : i32
    return %c0_i32, %c0_i32_0 : i32, i32
  }
  func.func @transform_8(%arg0: i32) -> (i32, i32, i32) {
    %c0_i32 = arith.constant 0 : i32
    %c0_i32_0 = arith.constant 0 : i32
    %c0_i32_1 = arith.constant 0 : i32
    return %arg0, %c0_i32, %c0_i32_0 : i32, i32, i32
  }
}

module attributes {stable_mosaic.version = 11 : i64} {
  func.func @transformer_block_kernel(%arg0: i32, %arg1: memref<1x8x32xf32, #tpu.memory_space<vmem>>, %arg2: memref<32x96xbf16, #tpu.memory_space<vmem>>, %arg3: memref<1x96xf32, #tpu.memory_space<vmem>>, %arg4: memref<32x32xbf16, #tpu.memory_space<vmem>>, %arg5: memref<8x32xf32, #tpu.memory_space<vmem>>, %arg6: memref<32x64xbf16, #tpu.memory_space<vmem>>, %arg7: memref<1x64xf32, #tpu.memory_space<vmem>>, %arg8: memref<64x32xbf16, #tpu.memory_space<vmem>>, %arg9: memref<1x8x32xf32, #tpu.memory_space<vmem>>) attributes {dimension_semantics = [#tpu.dimension_semantics<parallel>], iteration_bounds = array<i64: 2>, scalar_prefetch = 0 : i64, scratch_operands = 0 : i64, tpu.core_type = #tpu.core_type<tc>, window_params = [{transform_indices = @transform_0, window_bounds = array<i64: 1, 8, 32>}, {pipeline_mode = #tpu.pipeline_mode<synchronous>, transform_indices = @transform_1, window_bounds = array<i64: 32, 96>}, {pipeline_mode = #tpu.pipeline_mode<synchronous>, transform_indices = @transform_2, window_bounds = array<i64: 1, 96>}, {pipeline_mode = #tpu.pipeline_mode<synchronous>, transform_indices = @transform_3, window_bounds = array<i64: 32, 32>}, {pipeline_mode = #tpu.pipeline_mode<synchronous>, transform_indices = @transform_4, window_bounds = array<i64: 8, 32>}, {pipeline_mode = #tpu.pipeline_mode<synchronous>, transform_indices = @transform_5, window_bounds = array<i64: 32, 64>}, {pipeline_mode = #tpu.pipeline_mode<synchronous>, transform_indices = @transform_6, window_bounds = array<i64: 1, 64>}, {pipeline_mode = #tpu.pipeline_mode<synchronous>, transform_indices = @transform_7, window_bounds = array<i64: 64, 32>}, {transform_indices = @transform_8, window_bounds = array<i64: 1, 8, 32>}]} {
    %c0 = arith.constant 0 : index
    %c0_0 = arith.constant 0 : index
    %c0_1 = arith.constant 0 : index
    %0 = vector.load %arg1[%c0, %c0_0, %c0_1] : memref<1x8x32xf32, #tpu.memory_space<vmem>>, vector<1x8x32xf32>
    %1 = vector.shape_cast %0 : vector<1x8x32xf32> to vector<8x32xf32>
    %2 = arith.truncf %1 : vector<8x32xf32> to vector<8x32xbf16>
    %c0_2 = arith.constant 0 : index
    %c0_3 = arith.constant 0 : index
    %3 = vector.load %arg5[%c0_2, %c0_3] : memref<8x32xf32, #tpu.memory_space<vmem>>, vector<8x32xf32>
    %4 = vector.extract_strided_slice %3 {offsets = [0, 0], sizes = [1, 32], strides = [1, 1]} : vector<8x32xf32> to vector<1x32xf32>
    %5 = vector.extract_strided_slice %3 {offsets = [1, 0], sizes = [1, 32], strides = [1, 1]} : vector<8x32xf32> to vector<1x32xf32>
    %6 = vector.extract_strided_slice %3 {offsets = [2, 0], sizes = [1, 32], strides = [1, 1]} : vector<8x32xf32> to vector<1x32xf32>
    %7 = vector.extract_strided_slice %3 {offsets = [3, 0], sizes = [1, 32], strides = [1, 1]} : vector<8x32xf32> to vector<1x32xf32>
    %c0_4 = arith.constant 0 : index
    %c0_5 = arith.constant 0 : index
    %8 = vector.load %arg2[%c0_4, %c0_5] : memref<32x96xbf16, #tpu.memory_space<vmem>>, vector<32x96xbf16>
    %cst = arith.constant dense<0.000000e+00> : vector<8x96xf32>
    %9 = tpu.matmul %2, %8, %cst {dimension_numbers = #tpu.dot_dimension_numbers<[1], [0], [0], [1], [0, 0, 1, 1], [], []>} : vector<8x32xbf16>, vector<32x96xbf16>, vector<8x96xf32> -> vector<8x96xf32>
    %c0_6 = arith.constant 0 : index
    %c0_7 = arith.constant 0 : index
    %10 = vector.load %arg3[%c0_6, %c0_7] : memref<1x96xf32, #tpu.memory_space<vmem>>, vector<1x96xf32>
    %11 = vector.broadcast %10 : vector<1x96xf32> to vector<8x96xf32>
    %12 = arith.addf %9, %11 : vector<8x96xf32>
    %13 = vector.extract_strided_slice %12 {offsets = [0, 0], sizes = [8, 32], strides = [1, 1]} : vector<8x96xf32> to vector<8x32xf32>
    %cst_8 = arith.constant 0.353553385 : f32
    %14 = vector.broadcast %cst_8 : f32 to vector<8x32xf32>
    %15 = arith.mulf %13, %14 : vector<8x32xf32>
    %16 = vector.extract_strided_slice %12 {offsets = [0, 32], sizes = [8, 32], strides = [1, 1]} : vector<8x96xf32> to vector<8x32xf32>
    %17 = vector.extract_strided_slice %12 {offsets = [0, 64], sizes = [8, 32], strides = [1, 1]} : vector<8x96xf32> to vector<8x32xf32>
    %18 = vector.extract_strided_slice %15 {offsets = [0, 0], sizes = [8, 8], strides = [1, 1]} : vector<8x32xf32> to vector<8x8xf32>
    %19 = vector.shape_cast %18 : vector<8x8xf32> to vector<1x8x8xf32>
    %20 = vector.extract_strided_slice %16 {offsets = [0, 0], sizes = [8, 8], strides = [1, 1]} : vector<8x32xf32> to vector<8x8xf32>
    %21 = vector.shape_cast %20 : vector<8x8xf32> to vector<1x8x8xf32>
    %22 = vector.extract_strided_slice %17 {offsets = [0, 0], sizes = [8, 8], strides = [1, 1]} : vector<8x32xf32> to vector<8x8xf32>
    %23 = vector.shape_cast %22 : vector<8x8xf32> to vector<1x8x8xf32>
    %24 = arith.truncf %19 : vector<1x8x8xf32> to vector<1x8x8xbf16>
    %25 = arith.truncf %21 : vector<1x8x8xf32> to vector<1x8x8xbf16>
    "tpu.trace_start"() <{level = 10 : i32, message = "bqd,bkd->bqk"}> : () -> ()
    %cst_9 = arith.constant dense<0.000000e+00> : vector<1x8x8xf32>
    %26 = tpu.matmul %24, %25, %cst_9 {dimension_numbers = #tpu.dot_dimension_numbers<[2], [2], [1], [1], [0, 0, 0, 1, 1, 1], [0], [0]>} : vector<1x8x8xbf16>, vector<1x8x8xbf16>, vector<1x8x8xf32> -> vector<1x8x8xf32>
    "tpu.trace_stop"() : () -> ()
    %cst_10 = arith.constant dense<0xFF800000> : vector<1x8xf32>
    %27 = vector.multi_reduction <maximumf>, %26, %cst_10 [2] : vector<1x8x8xf32> to vector<1x8xf32>
    %28 = vector.shape_cast %27 : vector<1x8xf32> to vector<1x8x1xf32>
    %29 = vector.broadcast %28 : vector<1x8x1xf32> to vector<1x8x8xf32>
    %30 = arith.subf %26, %29 : vector<1x8x8xf32>
    %31 = math.exp %30 : vector<1x8x8xf32>
    %cst_11 = arith.constant dense<0.000000e+00> : vector<1x8xf32>
    %32 = vector.multi_reduction <add>, %31, %cst_11 [2] : vector<1x8x8xf32> to vector<1x8xf32>
    %33 = vector.shape_cast %32 : vector<1x8xf32> to vector<1x8x1xf32>
    %34 = tpu.reciprocal %33 {approx = true} : vector<1x8x1xf32> -> vector<1x8x1xf32>
    %35 = vector.broadcast %34 : vector<1x8x1xf32> to vector<1x8x8xf32>
    %36 = arith.mulf %31, %35 : vector<1x8x8xf32>
    %37 = arith.truncf %36 : vector<1x8x8xf32> to vector<1x8x8xbf16>
    %38 = arith.truncf %23 : vector<1x8x8xf32> to vector<1x8x8xbf16>
    "tpu.trace_start"() <{level = 10 : i32, message = "bqk,bkd->bqd"}> : () -> ()
    %cst_12 = arith.constant dense<0.000000e+00> : vector<1x8x8xf32>
    %39 = tpu.matmul %37, %38, %cst_12 {dimension_numbers = #tpu.dot_dimension_numbers<[2], [1], [1], [2], [0, 0, 0, 1, 1, 2], [0], [0]>} : vector<1x8x8xbf16>, vector<1x8x8xbf16>, vector<1x8x8xf32> -> vector<1x8x8xf32>
    "tpu.trace_stop"() : () -> ()
    %40 = vector.shape_cast %39 : vector<1x8x8xf32> to vector<8x8xf32>
    %41 = vector.extract_strided_slice %15 {offsets = [0, 8], sizes = [8, 8], strides = [1, 1]} : vector<8x32xf32> to vector<8x8xf32>
    %42 = vector.shape_cast %41 : vector<8x8xf32> to vector<1x8x8xf32>
    %43 = vector.extract_strided_slice %16 {offsets = [0, 8], sizes = [8, 8], strides = [1, 1]} : vector<8x32xf32> to vector<8x8xf32>
    %44 = vector.shape_cast %43 : vector<8x8xf32> to vector<1x8x8xf32>
    %45 = vector.extract_strided_slice %17 {offsets = [0, 8], sizes = [8, 8], strides = [1, 1]} : vector<8x32xf32> to vector<8x8xf32>
    %46 = vector.shape_cast %45 : vector<8x8xf32> to vector<1x8x8xf32>
    %47 = arith.truncf %42 : vector<1x8x8xf32> to vector<1x8x8xbf16>
    %48 = arith.truncf %44 : vector<1x8x8xf32> to vector<1x8x8xbf16>
    "tpu.trace_start"() <{level = 10 : i32, message = "bqd,bkd->bqk"}> : () -> ()
    %cst_13 = arith.constant dense<0.000000e+00> : vector<1x8x8xf32>
    %49 = tpu.matmul %47, %48, %cst_13 {dimension_numbers = #tpu.dot_dimension_numbers<[2], [2], [1], [1], [0, 0, 0, 1, 1, 1], [0], [0]>} : vector<1x8x8xbf16>, vector<1x8x8xbf16>, vector<1x8x8xf32> -> vector<1x8x8xf32>
    "tpu.trace_stop"() : () -> ()
    %cst_14 = arith.constant dense<0xFF800000> : vector<1x8xf32>
    %50 = vector.multi_reduction <maximumf>, %49, %cst_14 [2] : vector<1x8x8xf32> to vector<1x8xf32>
    %51 = vector.shape_cast %50 : vector<1x8xf32> to vector<1x8x1xf32>
    %52 = vector.broadcast %51 : vector<1x8x1xf32> to vector<1x8x8xf32>
    %53 = arith.subf %49, %52 : vector<1x8x8xf32>
    %54 = math.exp %53 : vector<1x8x8xf32>
    %cst_15 = arith.constant dense<0.000000e+00> : vector<1x8xf32>
    %55 = vector.multi_reduction <add>, %54, %cst_15 [2] : vector<1x8x8xf32> to vector<1x8xf32>
    %56 = vector.shape_cast %55 : vector<1x8xf32> to vector<1x8x1xf32>
    %57 = tpu.reciprocal %56 {approx = true} : vector<1x8x1xf32> -> vector<1x8x1xf32>
    %58 = vector.broadcast %57 : vector<1x8x1xf32> to vector<1x8x8xf32>
    %59 = arith.mulf %54, %58 : vector<1x8x8xf32>
    %60 = arith.truncf %59 : vector<1x8x8xf32> to vector<1x8x8xbf16>
    %61 = arith.truncf %46 : vector<1x8x8xf32> to vector<1x8x8xbf16>
    "tpu.trace_start"() <{level = 10 : i32, message = "bqk,bkd->bqd"}> : () -> ()
    %cst_16 = arith.constant dense<0.000000e+00> : vector<1x8x8xf32>
    %62 = tpu.matmul %60, %61, %cst_16 {dimension_numbers = #tpu.dot_dimension_numbers<[2], [1], [1], [2], [0, 0, 0, 1, 1, 2], [0], [0]>} : vector<1x8x8xbf16>, vector<1x8x8xbf16>, vector<1x8x8xf32> -> vector<1x8x8xf32>
    "tpu.trace_stop"() : () -> ()
    %63 = vector.shape_cast %62 : vector<1x8x8xf32> to vector<8x8xf32>
    %64 = vector.extract_strided_slice %15 {offsets = [0, 16], sizes = [8, 8], strides = [1, 1]} : vector<8x32xf32> to vector<8x8xf32>
    %65 = vector.shape_cast %64 : vector<8x8xf32> to vector<1x8x8xf32>
    %66 = vector.extract_strided_slice %16 {offsets = [0, 16], sizes = [8, 8], strides = [1, 1]} : vector<8x32xf32> to vector<8x8xf32>
    %67 = vector.shape_cast %66 : vector<8x8xf32> to vector<1x8x8xf32>
    %68 = vector.extract_strided_slice %17 {offsets = [0, 16], sizes = [8, 8], strides = [1, 1]} : vector<8x32xf32> to vector<8x8xf32>
    %69 = vector.shape_cast %68 : vector<8x8xf32> to vector<1x8x8xf32>
    %70 = arith.truncf %65 : vector<1x8x8xf32> to vector<1x8x8xbf16>
    %71 = arith.truncf %67 : vector<1x8x8xf32> to vector<1x8x8xbf16>
    "tpu.trace_start"() <{level = 10 : i32, message = "bqd,bkd->bqk"}> : () -> ()
    %cst_17 = arith.constant dense<0.000000e+00> : vector<1x8x8xf32>
    %72 = tpu.matmul %70, %71, %cst_17 {dimension_numbers = #tpu.dot_dimension_numbers<[2], [2], [1], [1], [0, 0, 0, 1, 1, 1], [0], [0]>} : vector<1x8x8xbf16>, vector<1x8x8xbf16>, vector<1x8x8xf32> -> vector<1x8x8xf32>
    "tpu.trace_stop"() : () -> ()
    %cst_18 = arith.constant dense<0xFF800000> : vector<1x8xf32>
    %73 = vector.multi_reduction <maximumf>, %72, %cst_18 [2] : vector<1x8x8xf32> to vector<1x8xf32>
    %74 = vector.shape_cast %73 : vector<1x8xf32> to vector<1x8x1xf32>
    %75 = vector.broadcast %74 : vector<1x8x1xf32> to vector<1x8x8xf32>
    %76 = arith.subf %72, %75 : vector<1x8x8xf32>
    %77 = math.exp %76 : vector<1x8x8xf32>
    %cst_19 = arith.constant dense<0.000000e+00> : vector<1x8xf32>
    %78 = vector.multi_reduction <add>, %77, %cst_19 [2] : vector<1x8x8xf32> to vector<1x8xf32>
    %79 = vector.shape_cast %78 : vector<1x8xf32> to vector<1x8x1xf32>
    %80 = tpu.reciprocal %79 {approx = true} : vector<1x8x1xf32> -> vector<1x8x1xf32>
    %81 = vector.broadcast %80 : vector<1x8x1xf32> to vector<1x8x8xf32>
    %82 = arith.mulf %77, %81 : vector<1x8x8xf32>
    %83 = arith.truncf %82 : vector<1x8x8xf32> to vector<1x8x8xbf16>
    %84 = arith.truncf %69 : vector<1x8x8xf32> to vector<1x8x8xbf16>
    "tpu.trace_start"() <{level = 10 : i32, message = "bqk,bkd->bqd"}> : () -> ()
    %cst_20 = arith.constant dense<0.000000e+00> : vector<1x8x8xf32>
    %85 = tpu.matmul %83, %84, %cst_20 {dimension_numbers = #tpu.dot_dimension_numbers<[2], [1], [1], [2], [0, 0, 0, 1, 1, 2], [0], [0]>} : vector<1x8x8xbf16>, vector<1x8x8xbf16>, vector<1x8x8xf32> -> vector<1x8x8xf32>
    "tpu.trace_stop"() : () -> ()
    %86 = vector.shape_cast %85 : vector<1x8x8xf32> to vector<8x8xf32>
    %87 = vector.extract_strided_slice %15 {offsets = [0, 24], sizes = [8, 8], strides = [1, 1]} : vector<8x32xf32> to vector<8x8xf32>
    %88 = vector.shape_cast %87 : vector<8x8xf32> to vector<1x8x8xf32>
    %89 = vector.extract_strided_slice %16 {offsets = [0, 24], sizes = [8, 8], strides = [1, 1]} : vector<8x32xf32> to vector<8x8xf32>
    %90 = vector.shape_cast %89 : vector<8x8xf32> to vector<1x8x8xf32>
    %91 = vector.extract_strided_slice %17 {offsets = [0, 24], sizes = [8, 8], strides = [1, 1]} : vector<8x32xf32> to vector<8x8xf32>
    %92 = vector.shape_cast %91 : vector<8x8xf32> to vector<1x8x8xf32>
    %93 = arith.truncf %88 : vector<1x8x8xf32> to vector<1x8x8xbf16>
    %94 = arith.truncf %90 : vector<1x8x8xf32> to vector<1x8x8xbf16>
    "tpu.trace_start"() <{level = 10 : i32, message = "bqd,bkd->bqk"}> : () -> ()
    %cst_21 = arith.constant dense<0.000000e+00> : vector<1x8x8xf32>
    %95 = tpu.matmul %93, %94, %cst_21 {dimension_numbers = #tpu.dot_dimension_numbers<[2], [2], [1], [1], [0, 0, 0, 1, 1, 1], [0], [0]>} : vector<1x8x8xbf16>, vector<1x8x8xbf16>, vector<1x8x8xf32> -> vector<1x8x8xf32>
    "tpu.trace_stop"() : () -> ()
    %cst_22 = arith.constant dense<0xFF800000> : vector<1x8xf32>
    %96 = vector.multi_reduction <maximumf>, %95, %cst_22 [2] : vector<1x8x8xf32> to vector<1x8xf32>
    %97 = vector.shape_cast %96 : vector<1x8xf32> to vector<1x8x1xf32>
    %98 = vector.broadcast %97 : vector<1x8x1xf32> to vector<1x8x8xf32>
    %99 = arith.subf %95, %98 : vector<1x8x8xf32>
    %100 = math.exp %99 : vector<1x8x8xf32>
    %cst_23 = arith.constant dense<0.000000e+00> : vector<1x8xf32>
    %101 = vector.multi_reduction <add>, %100, %cst_23 [2] : vector<1x8x8xf32> to vector<1x8xf32>
    %102 = vector.shape_cast %101 : vector<1x8xf32> to vector<1x8x1xf32>
    %103 = tpu.reciprocal %102 {approx = true} : vector<1x8x1xf32> -> vector<1x8x1xf32>
    %104 = vector.broadcast %103 : vector<1x8x1xf32> to vector<1x8x8xf32>
    %105 = arith.mulf %100, %104 : vector<1x8x8xf32>
    %106 = arith.truncf %105 : vector<1x8x8xf32> to vector<1x8x8xbf16>
    %107 = arith.truncf %92 : vector<1x8x8xf32> to vector<1x8x8xbf16>
    "tpu.trace_start"() <{level = 10 : i32, message = "bqk,bkd->bqd"}> : () -> ()
    %cst_24 = arith.constant dense<0.000000e+00> : vector<1x8x8xf32>
    %108 = tpu.matmul %106, %107, %cst_24 {dimension_numbers = #tpu.dot_dimension_numbers<[2], [1], [1], [2], [0, 0, 0, 1, 1, 2], [0], [0]>} : vector<1x8x8xbf16>, vector<1x8x8xbf16>, vector<1x8x8xf32> -> vector<1x8x8xf32>
    "tpu.trace_stop"() : () -> ()
    %109 = vector.shape_cast %108 : vector<1x8x8xf32> to vector<8x8xf32>
    %110 = tpu.concatenate %40, %63, %86, %109 in 1 : vector<8x8xf32>, vector<8x8xf32>, vector<8x8xf32>, vector<8x8xf32> -> vector<8x32xf32>
    %111 = arith.truncf %110 : vector<8x32xf32> to vector<8x32xbf16>
    %c0_25 = arith.constant 0 : index
    %c0_26 = arith.constant 0 : index
    %112 = vector.load %arg4[%c0_25, %c0_26] : memref<32x32xbf16, #tpu.memory_space<vmem>>, vector<32x32xbf16>
    %cst_27 = arith.constant dense<0.000000e+00> : vector<8x32xf32>
    %113 = tpu.matmul %111, %112, %cst_27 {dimension_numbers = #tpu.dot_dimension_numbers<[1], [0], [0], [1], [0, 0, 1, 1], [], []>} : vector<8x32xbf16>, vector<32x32xbf16>, vector<8x32xf32> -> vector<8x32xf32>
    %114 = vector.broadcast %4 : vector<1x32xf32> to vector<8x32xf32>
    %115 = arith.addf %113, %114 : vector<8x32xf32>
    %116 = arith.mulf %115, %115 : vector<8x32xf32>
    %cst_28 = arith.constant dense<0.000000e+00> : vector<8xf32>
    %117 = vector.multi_reduction <add>, %116, %cst_28 [1] : vector<8x32xf32> to vector<8xf32>
    %118 = vector.shape_cast %117 : vector<8xf32> to vector<8x1xf32>
    %cst_29 = arith.constant 3.200000e+01 : f32
    %119 = vector.broadcast %cst_29 : f32 to vector<8x1xf32>
    %120 = arith.divf %118, %119 : vector<8x1xf32>
    %cst_30 = arith.constant 9.99999997E-7 : f32
    %121 = vector.broadcast %cst_30 : f32 to vector<8x1xf32>
    %122 = arith.addf %120, %121 : vector<8x1xf32>
    %123 = math.rsqrt %122 : vector<8x1xf32>
    %124 = vector.broadcast %123 : vector<8x1xf32> to vector<8x32xf32>
    %125 = arith.mulf %115, %124 : vector<8x32xf32>
    %126 = vector.broadcast %6 : vector<1x32xf32> to vector<8x32xf32>
    %127 = arith.mulf %126, %125 : vector<8x32xf32>
    %128 = arith.addf %1, %127 : vector<8x32xf32>
    %129 = arith.truncf %128 : vector<8x32xf32> to vector<8x32xbf16>
    %c0_31 = arith.constant 0 : index
    %c0_32 = arith.constant 0 : index
    %130 = vector.load %arg6[%c0_31, %c0_32] : memref<32x64xbf16, #tpu.memory_space<vmem>>, vector<32x64xbf16>
    %cst_33 = arith.constant dense<0.000000e+00> : vector<8x64xf32>
    %131 = tpu.matmul %129, %130, %cst_33 {dimension_numbers = #tpu.dot_dimension_numbers<[1], [0], [0], [1], [0, 0, 1, 1], [], []>} : vector<8x32xbf16>, vector<32x64xbf16>, vector<8x64xf32> -> vector<8x64xf32>
    %c0_34 = arith.constant 0 : index
    %c0_35 = arith.constant 0 : index
    %132 = vector.load %arg7[%c0_34, %c0_35] : memref<1x64xf32, #tpu.memory_space<vmem>>, vector<1x64xf32>
    %133 = vector.broadcast %132 : vector<1x64xf32> to vector<8x64xf32>
    %134 = arith.addf %131, %133 : vector<8x64xf32>
    %135 = arith.negf %134 : vector<8x64xf32>
    %136 = math.exp %135 : vector<8x64xf32>
    %cst_36 = arith.constant 1.000000e+00 : f32
    %137 = vector.broadcast %cst_36 : f32 to vector<8x64xf32>
    %138 = arith.addf %137, %136 : vector<8x64xf32>
    %139 = arith.divf %137, %138 : vector<8x64xf32>
    %140 = arith.mulf %134, %139 : vector<8x64xf32>
    %141 = arith.truncf %140 : vector<8x64xf32> to vector<8x64xbf16>
    %c0_37 = arith.constant 0 : index
    %c0_38 = arith.constant 0 : index
    %142 = vector.load %arg8[%c0_37, %c0_38] : memref<64x32xbf16, #tpu.memory_space<vmem>>, vector<64x32xbf16>
    %cst_39 = arith.constant dense<0.000000e+00> : vector<8x32xf32>
    %143 = tpu.matmul %141, %142, %cst_39 {dimension_numbers = #tpu.dot_dimension_numbers<[1], [0], [0], [1], [0, 0, 1, 1], [], []>} : vector<8x64xbf16>, vector<64x32xbf16>, vector<8x32xf32> -> vector<8x32xf32>
    %144 = vector.broadcast %5 : vector<1x32xf32> to vector<8x32xf32>
    %145 = arith.addf %143, %144 : vector<8x32xf32>
    %146 = arith.mulf %145, %145 : vector<8x32xf32>
    %cst_40 = arith.constant dense<0.000000e+00> : vector<8xf32>
    %147 = vector.multi_reduction <add>, %146, %cst_40 [1] : vector<8x32xf32> to vector<8xf32>
    %148 = vector.shape_cast %147 : vector<8xf32> to vector<8x1xf32>
    %cst_41 = arith.constant 3.200000e+01 : f32
    %149 = vector.broadcast %cst_41 : f32 to vector<8x1xf32>
    %150 = arith.divf %148, %149 : vector<8x1xf32>
    %cst_42 = arith.constant 9.99999997E-7 : f32
    %151 = vector.broadcast %cst_42 : f32 to vector<8x1xf32>
    %152 = arith.addf %150, %151 : vector<8x1xf32>
    %153 = math.rsqrt %152 : vector<8x1xf32>
    %154 = vector.broadcast %153 : vector<8x1xf32> to vector<8x32xf32>
    %155 = arith.mulf %145, %154 : vector<8x32xf32>
    %156 = vector.broadcast %7 : vector<1x32xf32> to vector<8x32xf32>
    %157 = arith.mulf %156, %155 : vector<8x32xf32>
    %158 = arith.addf %128, %157 : vector<8x32xf32>
    %159 = vector.shape_cast %158 : vector<8x32xf32> to vector<1x8x32xf32>
    %c0_43 = arith.constant 0 : index
    %c0_44 = arith.constant 0 : index
    %c0_45 = arith.constant 0 : index
    %160 = vector.load %arg9[%c0_43, %c0_44, %c0_45] : memref<1x8x32xf32, #tpu.memory_space<vmem>>, vector<1x8x32xf32>
    tpu.vector_store %arg9[%c0_43, %c0_44, %c0_45], %159 {strides = array<i32>} : memref<1x8x32xf32, #tpu.memory_space<vmem>>, vector<1x8x32xf32>,
    return
  }
  func.func @transform_0(%arg0: i32) -> (i32, i32, i32) {
    %c0_i32 = arith.constant 0 : i32
    %c0_i32_0 = arith.constant 0 : i32
    %c0_i32_1 = arith.constant 0 : i32
    return %arg0, %c0_i32, %c0_i32_0 : i32, i32, i32
  }
  func.func @transform_1(%arg0: i32) -> (i32, i32) {
    %c0_i32 = arith.constant 0 : i32
    %c0_i32_0 = arith.constant 0 : i32
    %c0_i32_1 = arith.constant 0 : i32
    return %c0_i32, %c0_i32_0 : i32, i32
  }
  func.func @transform_2(%arg0: i32) -> (i32, i32) {
    %c0_i32 = arith.constant 0 : i32
    %c0_i32_0 = arith.constant 0 : i32
    %c0_i32_1 = arith.constant 0 : i32
    return %c0_i32, %c0_i32_0 : i32, i32
  }
  func.func @transform_3(%arg0: i32) -> (i32, i32) {
    %c0_i32 = arith.constant 0 : i32
    %c0_i32_0 = arith.constant 0 : i32
    %c0_i32_1 = arith.constant 0 : i32
    return %c0_i32, %c0_i32_0 : i32, i32
  }
  func.func @transform_4(%arg0: i32) -> (i32, i32) {
    %c0_i32 = arith.constant 0 : i32
    %c0_i32_0 = arith.constant 0 : i32
    %c0_i32_1 = arith.constant 0 : i32
    return %c0_i32, %c0_i32_0 : i32, i32
  }
  func.func @transform_5(%arg0: i32) -> (i32, i32) {
    %c0_i32 = arith.constant 0 : i32
    %c0_i32_0 = arith.constant 0 : i32
    %c0_i32_1 = arith.constant 0 : i32
    return %c0_i32, %c0_i32_0 : i32, i32
  }
  func.func @transform_6(%arg0: i32) -> (i32, i32) {
    %c0_i32 = arith.constant 0 : i32
    %c0_i32_0 = arith.constant 0 : i32
    %c0_i32_1 = arith.constant 0 : i32
    return %c0_i32, %c0_i32_0 : i32, i32
  }
  func.func @transform_7(%arg0: i32) -> (i32, i32) {
    %c0_i32 = arith.constant 0 : i32
    %c0_i32_0 = arith.constant 0 : i32
    %c0_i32_1 = arith.constant 0 : i32
    return %c0_i32, %c0_i32_0 : i32, i32
  }
  func.func @transform_8(%arg0: i32) -> (i32, i32, i32) {
    %c0_i32 = arith.constant 0 : i32
    %c0_i32_0 = arith.constant 0 : i32
    %c0_i32_1 = arith.constant 0 : i32
    return %arg0, %c0_i32, %c0_i32_0 : i32, i32, i32
  }
}

</mosaic_0001>

<bundles_post_ra>
// kernel: tpu_custom_call.1
= control target key start
LH: loop header
LB: loop body
LE: loop exit
PB: predicated region body
PF: predicated region fallthrough
CT: control target
= control target key end

     0   :  { %13 = vsyncpa [#allocation3], 0  ;;  %s2144_s0 = inlined_call_operand.vmem [shape: f32[2,8,32], index: 0, kind: input, shape index: {}]   ;;  %s2145_s1 = inlined_call_operand.vmem [shape: bf16[32,96], index: 1, kind: input, shape index: {}]   ;;  %s2146_s2 = inlined_call_operand.vmem [shape: f32[1,96], index: 2, kind: input, shape index: {}]   ;;  %s2147_s3 = inlined_call_operand.vmem [shape: bf16[32,32], index: 3, kind: input, shape index: {}]   ;;  %s2148_s4 = inlined_call_operand.hbm [shape: f32[8,32], index: 4, kind: input, shape index: {}]   ;;  %s2149_s5 = inlined_call_operand.hbm [shape: bf16[32,64], index: 5, kind: input, shape index: {}]   ;;  %s2150_s6 = inlined_call_operand.vmem [shape: f32[1,64], index: 6, kind: input, shape index: {}]   ;;  %s2151_s7 = inlined_call_operand.vmem [shape: bf16[64,32], index: 7, kind: input, shape index: {}]   ;;  %s2152_s8 = inlined_call_operand.hbm [shape: f32[2,8,32], index: 8, kind: output, shape index: {}]  }
   0x1   :  { %14 = vsyncpa [#allocation6], 0 }
   0x2   :  { %15 = vsyncpa [#allocation4], 0 }
   0x3   :  { %17 = vsyncpa [#allocation4 + $0x1], 0  ;;  %s1765_s27 = smov 0   ;;  %s1767_s28 = smov 0  }
   0x4   :  { %s1769_s29 = smov 0   ;;  %s1771_s30 = smov 0  }
   0x5 LB: > { %s1786_s9 = sadd.s32 4294967295, %s1703_s30   ;;  %s1375_s10 = sadd.s32 4294967294, %s1703_s30   ;;  %s1703_s30 = sphi %s1771_s30, %s2159_s30   ;;  %s1699_s29 = sphi %s1769_s29, %s2158_s29   ;;  %s1695_s28 = sphi %s1767_s28, %s2157_s28   ;;  %s1691_s27 = sphi %s1765_s27, %s2156_s27  }
   0x6   : > { %s1790_s11 = sadd.s32 1, %s1703_s30   ;;  %s203_s12 = sadd.s32 1, %s1699_s29 }
   0x7   : > { %s200_s13 = ssub.s32 %s1703_s30, %s1790_s11  ;;  %p213_p0 = scmp.ne.s32.totalorder %s1699_s29, %s1695_s28 }
   0x8   : > { %p201_p1 = scmp.eq.s32.totalorder %s200_s13, 0  ;;  %p214_p2 = scmp.eq.s32.totalorder %s1786_s9, 1 }
   0x9   : > { %p219_p3 = scmp.ne.s32.totalorder %s1695_s28, %s1691_s27  ;;  %p220_p4 = scmp.eq.s32.totalorder %s1375_s10, 1 }
   0xa   : > { %s1801_s14 = scalar_select %p201_p1, %s1699_s29, %s203_s12  }
   0xb   : > { %p1803_p5 = por %p214_p2, %p213_p0  ;;  %p1807_p6 = por %p220_p4, %p219_p3 }
   0xc   : > { %p1376_p7 = scmp.ge.s32.totalorder %s1703_s30, 1  ;;  %p227_p8 = scmp.lt.s32.totalorder %s1703_s30, 3 }
   0xd   : > { %p1473_p9 = scmp.eq.s32.totalorder %s1786_s9, 0  ;;  %s248_s20 = sshll.u32 %s2148_s4, 4  ;;  %s249_s20 = int_to_ptr.hbm [resolvable:$true] %s248_s20 }
   0xe   : > { %p1814_p10 = pnand %p1376_p7, %p227_p8  ;;  %s1705_s21 = smov [#allocation2]  }
   0xf   : > { %s250_s22 = sshll.u32 %s1705_s21, 4  ;;  %s259_s25 = sshll.u32 %s2149_s5, 4  ;;  %s251_s22 = int_to_ptr.vmem [resolvable:$true] %s250_s22  ;;  %s260_s25 = int_to_ptr.hbm [resolvable:$true] %s259_s25 }
  0x10   : > { %p1462_p11 = pneg %p1814_p10  ;;  %s1706_s26 = smov [#allocation5]  }
  0x11   : > { %s261_s10 = sshll.u32 %s1706_s26, 4  ;;  %s1707_s12 = smov 64   ;;  %s262_s10 = int_to_ptr.vmem [resolvable:$true] %s261_s10 }
  0x12   : > { %p1463_p12 = pnand %p1473_p9, %p1462_p11  ;;  %s1708_s13 = smov 4  }
  0x13   : > { %290 = sbr.rel (%p1814_p10) target bundleno = 1837 (0x72d), region = 52 }
  0x14   : > { %1465 = dma.hbm_to_vmem [thread:$0]  (!%p1463_p12), %s249_s20, 128, %s251_s22, [#allocation3]  }
  0x15   : > { %1468 = dma.hbm_to_vmem [thread:$0]  (!%p1463_p12), %s260_s25, 256, %s262_s10, [#allocation6], %s1707_s12, %s1707_s12, %s1708_s13  }
  0x18   : > { %1678 = dma.done.wait (%p1473_p9), [#allocation3], 128  }
  0x19   : > { %1680 = vsyncadd (%p1473_p9), [#allocation3], 4294967168 }
  0x1a   : > { %1682 = dma.done.wait (%p1473_p9), [#allocation6], 256  }
  0x1b   : > { %1684 = vsyncadd (%p1473_p9), [#allocation6], 4294967040  ;;  %p329_p13 = scmp.lt.s32.totalorder %s1786_s9, 1  ;;  %v1443_v0 = vld [vmem:[%s2145_s1 + $0x8] sm:$0xff]  ;;  %v1442_v1 = vld [vmem:[%s2145_s1] sm:$0xff]  ;;  %vm357_vm0 = vcmask 261120  }
  0x1c   : > { %367 = vmatpush.bf16.msra.mxu0 %v1443_v0  ;;  %v1545_v4 = vld [vmem:[%s2146_s2] ss:$0 sm:$0xff]  ;;  %s1709_s12 = smov 104   ;;  %s1710_s13 = smov 120   ;;  %v1713_v15 = vmov 1983009808  }
  0x1d   : > { %s330_s18 = scalar_select %p329_p13, %s1786_s9, 1  ;;  %v391_v16 = vunpack.c.l.s4 %v1713_v15  ;;  %vm386_vm1 = vcmask 1047556   ;;  %v1714_v23 = vmov 1934713408   ;;  %vm755_vm2 = vcmask 64512  }
  0x1e   : > { %v415_v24 = vunpack.c.l.s4 %v1714_v23  ;;  %s1715_s20 = smov 64   ;;  %vm887_vm3 = vcmask 1043456   ;;  %s1716_s17 = smov 16   ;;  %vm1084_vm4 = vcmask 130048   ;;  %vm1086_vm5 = vcmask 195584  }
  0x1f   : > { %s1384_s19 = sshll.u32 %s330_s18, 3  ;;  %s1711_s18 = smov 112   ;;  %v1863_v20 = vunpack.c.0.s8 %v391_v16  ;;  %vm1240_vm14 = vcmask 523264  }
  0x20   : > { %s332_s21 = scalar_lea.vmem %s2144_s0, %s1384_s19  ;;  %368 = vmatpush.bf16.msra.mxu0 %v1442_v1  ;;  %s1712_s19 = smov 96   ;;  %v1872_v40 = vunpack.c.0.s8 %v415_v24 }
  0x21   : > { %v1849_v2 = vld [vmem:[%s332_s21] sm:$0xff]  ;;  %s1717_s21 = smov 8   ;;  %s1718_s22 = smov 24  }
  0x22   : > { %v335_v3 = vpack.c.bf16 %v1849_v2, %v1849_v2  ;;  %s326_s24 = sand.u32 1, %s1695_s28   ;;  %s1439_s26 = sshll.u32 %s1786_s9, 3 }
  0x23   : > { %s1383_s25 = sshll.u32 %s326_s24, 3  ;;  %s1279_s9 = scalar_lea.sflag [#allocation4], %s326_s24 }
  0x24   : > { %1393 = vmatmul.msk.bf16.vlgmr.msra.gmra.mxu0 %vm357_vm0, %v335_v3 }
  0xa1   : > { %v370_v5 = vpop.f32.mrf.mxu0 }
  0xa2   : > { %v371_v6 = vadd.f32 %v1545_v4, %v370_v5 }
  0xa4   : > { %501 = vrot.lane.b32.xlu1 %v371_v6, %s1709_s12  ;;  %497 = vrot.lane.b32.xlu0 %v371_v6, %s1710_s13  ;;  %v374_v8 = vmul.f32 0.35355338, %v371_v6 }
  0xa6   : > { %v388_v22 = vrot.slane %v374_v8, 4 }
  0xa9   : > { %v372_v7 = vpop.f32.mrf.mxu0 }
  0xac   : > { %499 = vrot.lane.b32.xlu0 %v371_v6, %s1711_s18 }
  0xb4   : > { %379 = vrot.lane.b32.xlu0 %v374_v8, %s1711_s18  ;;  %s328_s18 = scalar_lea.vmem [#allocation7], %s1383_s25  ;;  %s1653_s25 = scalar_lea.hbm %s2152_s8, 16 }
 0x116   : > { %v498_v9 = vpop.permute.xlu0 %497  ;;  %v502_v11 = vpop.permute.xlu1 %501 }
 0x117   : > { %v1857_v10 = vpack.i.bf16 %v498_v9, %v371_v6 }
 0x119   : > { %1526 = vrot.lane.b32.xlu1 %v1857_v10, %s1712_s19 }
 0x11e   : > { %v500_v12 = vpop.permute.xlu0 %499 }
 0x11f   : > { %v1860_v13 = vpack.i.bf16 %v502_v11, %v500_v12 }
 0x121   : > { %1531 = vrot.lane.b32.xlu2 %v1860_v13, %s1712_s19  ;;  %382 = vrot.lane.b32.xlu1 %v374_v8, %s1709_s12  ;;  %s1291_s19 = sshll.u32 %s328_s18, 4  ;;  %s1292_s19 = int_to_ptr.vmem [resolvable:$true] %s1291_s19 }
 0x126   : > { %v380_v17 = vpop.permute.xlu0 %379 }
 0x127   : > { %v385_v21 = vrot.slane %v380_v17, 4  ;;  %v389_v30 = vsel %vm386_vm1, %v380_v17, %v388_v22 }
 0x128   : > { %v397_v39 = vperm.slane %v389_v30, %v1863_v20 }
 0x129   : > { %376 = vrot.lane.b32.xlu2 %v374_v8, %s1710_s13  ;;  %v387_v35 = vsel %vm386_vm1, %v385_v21, %v374_v8  ;;  %s1289_s13 = scalar_lea.hbm %s2152_s8, %s1439_s26 }
 0x12a   : > { %v393_v47 = vperm.slane %v387_v35, %v1863_v20  ;;  %v424_v58 = vrot.slane %v397_v39, 4 }
 0x12c   : > { %v412_v3 = vrot.slane %v393_v47, 4 }
 0x17b   : > { %v1532_v14 = vpop.permute.xlu2 %1531 }
 0x17c   : > { %v1534_v18 = vunpack.i.h.bf16 %v1532_v14  ;;  %v1533_v19 = vunpack.i.l.bf16 %v1532_v14 }
 0x17e   : > { %v527_v26 = vrot.slane %v1534_v18, 4  ;;  %v515_v27 = vrot.slane %v1533_v19, 4 }
 0x183   : > { %v377_v36 = vpop.permute.xlu2 %376 }
 0x184   : > { %v400_v48 = vrot.slane %v377_v36, 4 }
 0x18b   : > { %v1527_v25 = vpop.permute.xlu1 %1526 }
 0x18c   : > { %v1529_v28 = vunpack.i.h.bf16 %v1527_v25  ;;  %v1528_v29 = vunpack.i.l.bf16 %v1527_v25 }
 0x18e   : > { %v529_v31 = vrot.slane %v1529_v28, 4  ;;  %v516_v32 = vsel %vm386_vm1, %v515_v27, %v1528_v29  ;;  %v517_v33 = vrot.slane %v1528_v29, 4  ;;  %v528_v34 = vsel %vm386_vm1, %v527_v26, %v1529_v28 }
 0x18f   : > { %v522_v37 = vperm.slane %v516_v32, %v1863_v20  ;;  %v534_v38 = vperm.slane %v528_v34, %v1863_v20 }
 0x190   : > { %v518_v41 = vsel %vm386_vm1, %v1533_v19, %v517_v33  ;;  %v530_v42 = vsel %vm386_vm1, %v1534_v18, %v529_v31 }
 0x191   : > { %v526_v43 = vperm.slane %v518_v41, %v1863_v20  ;;  %v538_v44 = vperm.slane %v530_v42, %v1863_v20  ;;  %v539_v45 = vrot.slane %v534_v38, 4  ;;  %v541_v46 = vrot.slane %v522_v37, 4 }
 0x193   : > { %v540_v49 = vsel %vm386_vm1, %v539_v45, %v522_v37  ;;  %v542_v50 = vsel %vm386_vm1, %v534_v38, %v541_v46  ;;  %v551_v51 = vrot.slane %v538_v44, 4  ;;  %v553_v52 = vrot.slane %v526_v43, 4  ;;  %v383_v53 = vpop.permute.xlu1 %382 }
 0x194   : > { %v546_v54 = vperm.slane %v540_v49, %v1872_v40  ;;  %v550_v55 = vperm.slane %v542_v50, %v1872_v40  ;;  %v398_v56 = vrot.slane %v383_v53, 4  ;;  %v401_v57 = vsel %vm386_vm1, %v383_v53, %v400_v48 }
 0x195   : > { %v552_v59 = vsel %vm386_vm1, %v551_v51, %v526_v43  ;;  %v554_v60 = vsel %vm386_vm1, %v538_v44, %v553_v52  ;;  %v409_v61 = vperm.slane %v401_v57, %v1863_v20 }
 0x196   : > { %v558_v62 = vperm.slane %v552_v59, %v1872_v40  ;;  %v562_v63 = vperm.slane %v554_v60, %v1872_v40  ;;  %v563_v0 = vrot.slane %v546_v54, 4  ;;  %v565_v1 = vrot.slane %v550_v55, 4 }
 0x197   : > { %v399_v4 = vsel %vm386_vm1, %v398_v56, %v377_v36  ;;  %v422_v5 = vrot.slane %v409_v61, 4  ;;  %v425_v6 = vsel %vm386_vm1, %v409_v61, %v424_v58 }
 0x198   : > { %v564_v7 = vsel %vm386_vm1, 0.0, %v563_v0  ;;  %v566_v8 = vsel %vm386_vm1, 0.0, %v565_v1  ;;  %v567_v9 = vrot.slane %v558_v62, 4  ;;  %v569_v11 = vrot.slane %v562_v63, 4 }
 0x199   : > { %v571_v12 = vsel %vm386_vm1, %v565_v1, %v546_v54  ;;  %v576_v14 = vrot.slane %v566_v8, 4  ;;  %v405_v15 = vperm.slane %v399_v4, %v1863_v20  ;;  %v423_v16 = vsel %vm386_vm1, %v422_v5, %v397_v39 }
 0x19a   : > { %v570_v17 = vsel %vm386_vm1, 0.0, %v569_v11  ;;  %v429_v18 = vperm.slane %v423_v16, %v1872_v40  ;;  %v433_v19 = vperm.slane %v425_v6, %v1872_v40  ;;  %v568_v21 = vsel %vm386_vm1, 0.0, %v567_v9 }
 0x19b   : > { %v587_v22 = vrot.slane %v570_v17, 4  ;;  %v410_v23 = vrot.slane %v405_v15, 4  ;;  %v413_v24 = vsel %vm386_vm1, %v405_v15, %v412_v3  ;;  %v575_v25 = vperm.slane %v571_v12, %v1863_v20 }
 0x19c   : > { %v421_v26 = vperm.slane %v413_v24, %v1872_v40  ;;  %v438_v27 = vrot.slane %v429_v18, 4  ;;  %v440_v28 = vrot.slane %v433_v19, 4  ;;  %v577_v29 = vsel %vm386_vm1, %v576_v14, %v564_v7 }
 0x19d   : > { %v411_v30 = vsel %vm386_vm1, %v410_v23, %v393_v47  ;;  %v581_v31 = vperm.slane %v577_v29, %v1863_v20  ;;  %v582_v32 = vsel %vm386_vm1, %v569_v11, %v558_v62  ;;  %v588_v33 = vsel %vm386_vm1, %v587_v22, %v568_v21 }
 0x19e   : > { %v417_v34 = vperm.slane %v411_v30, %v1872_v40  ;;  %v436_v35 = vrot.slane %v421_v26, 4  ;;  %v439_v36 = vsel %vm386_vm1, 0.0, %v438_v27  ;;  %v441_v37 = vsel %vm386_vm1, 0.0, %v440_v28 }
 0x19f   : > { %v453_v38 = vsel %vm386_vm1, %v440_v28, %v429_v18  ;;  %v458_v39 = vrot.slane %v441_v37, 4  ;;  %v586_v41 = vperm.slane %v582_v32, %v1863_v20  ;;  %v592_v42 = vperm.slane %v588_v33, %v1863_v20 }
 0x1a0   : > { %v434_v43 = vrot.slane %v417_v34, 4  ;;  %v437_v44 = vsel %vm386_vm1, 0.0, %v436_v35  ;;  %v442_v45 = vsel %vm386_vm1, %v436_v35, %v417_v34  ;;  %v457_v46 = vperm.slane %v453_v38, %v1863_v20 }
 0x1a1   : > { %v446_v47 = vperm.slane %v442_v45, %v1863_v20  ;;  %v447_v48 = vrot.slane %v437_v44, 4  ;;  %v459_v49 = vsel %vm386_vm1, %v458_v39, %v439_v36  ;;  %v595_v50 = vrot.slane %v575_v25, 4 }
 0x1a2   : > { %v435_v51 = vsel %vm386_vm1, 0.0, %v434_v43  ;;  %v463_v52 = vperm.slane %v459_v49, %v1863_v20  ;;  %v478_v53 = vrot.slane %v457_v46, 4  ;;  %v607_v54 = vrot.slane %v586_v41, 4 }
 0x1a3   : > { %v448_v55 = vsel %vm386_vm1, %v447_v48, %v435_v51  ;;  %v596_v56 = vsel %vm386_vm1, %v581_v31, %v595_v50  ;;  %v593_v57 = vrot.slane %v581_v31, 4  ;;  %v605_v58 = vrot.slane %v592_v42, 4 }
 0x1a4   : > { %v604_v59 = vperm.slane %v596_v56, %v1872_v40  ;;  %v608_v60 = vsel %vm386_vm1, %v592_v42, %v607_v54  ;;  %v452_v61 = vperm.slane %v448_v55, %v1863_v20  ;;  %v466_v62 = vrot.slane %v446_v47, 4 }
 0x1a5   : > { %v616_v63 = vperm.slane %v608_v60, %v1872_v40  ;;  %v594_v0 = vsel %vm386_vm1, %v593_v57, %v575_v25  ;;  %v606_v1 = vsel %vm386_vm1, %v605_v58, %v586_v41  ;;  %v479_v3 = vsel %vm386_vm1, %v463_v52, %v478_v53 }
 0x1a6   : > { %v623_v4 = vrot.slane %v604_v59, 4  ;;  %v600_v5 = vperm.slane %v594_v0, %v1872_v40  ;;  %v612_v6 = vperm.slane %v606_v1, %v1872_v40  ;;  %v467_v7 = vsel %vm386_vm1, %v452_v61, %v466_v62 }
 0x1a7   : > { %v621_v8 = vrot.slane %v616_v63, 4  ;;  %v475_v9 = vperm.slane %v467_v7, %v1872_v40  ;;  %v487_v11 = vperm.slane %v479_v3, %v1872_v40  ;;  %v464_v12 = vrot.slane %v452_v61, 4 }
 0x1a8   : > { %v624_v14 = vsel %vm386_vm1, %v616_v63, %v623_v4  ;;  %v619_v15 = vrot.slane %v600_v5, 4  ;;  %v617_v16 = vrot.slane %v612_v6, 4  ;;  %v476_v17 = vrot.slane %v463_v52, 4 }
 0x1a9   : > { %v754_v18 = vpack.c.bf16 %v624_v14, %v624_v14  ;;  %v622_v19 = vsel %vm386_vm1, %v621_v8, %v604_v59  ;;  %v494_v21 = vrot.slane %v475_v9, 4  ;;  %v465_v22 = vsel %vm386_vm1, %v464_v12, %v446_v47 }
 0x1aa   : > { %v620_v23 = vsel %vm386_vm1, %v612_v6, %v619_v15  ;;  %v753_v24 = vpack.c.bf16 %v622_v19, %v622_v19  ;;  %v618_v25 = vsel %vm386_vm1, %v617_v16, %v600_v5  ;;  %v471_v26 = vperm.slane %v465_v22, %v1872_v40 }
 0x1ab   : > { %v817_v27 = vsel %vm755_vm2, %v754_v18, 0  ;;  %v752_v28 = vpack.c.bf16 %v620_v23, %v620_v23  ;;  %v751_v29 = vpack.c.bf16 %v618_v25, %v618_v25  ;;  %v477_v31 = vsel %vm386_vm1, %v476_v17, %v457_v46 }
 0x1ac   : > { %826 = vmatpush.bf16.xpose.msrb.mxu0 %v817_v27  ;;  %v798_v30 = vsel %vm755_vm2, %v753_v24, 0  ;;  %v490_v32 = vrot.slane %v471_v26, 4  ;;  %v483_v35 = vperm.slane %v477_v31, %v1872_v40  ;;  %v492_v36 = vrot.slane %v487_v11, 4 }
 0x1ad   : > { %v779_v33 = vsel %vm755_vm2, %v752_v28, 0  ;;  %807 = vmatpush.bf16.xpose.msra.mxu3 %v798_v30  ;;  %v760_v34 = vsel %vm755_vm2, %v751_v29, 0  ;;  %v495_v37 = vsel %vm386_vm1, %v487_v11, %v494_v21 }
 0x1ae   : > { %788 = vmatpush.bf16.xpose.msra.mxu2 %v779_v33  ;;  %769 = vmatpush.bf16.xpose.msra.mxu1 %v760_v34  ;;  %v493_v38 = vsel %vm386_vm1, %v492_v36, %v475_v9  ;;  %v488_v39 = vrot.slane %v483_v35, 4  ;;  %v491_v41 = vsel %vm386_vm1, %v483_v35, %v490_v32  ;;  %v750_v42 = vpack.c.bf16 %v495_v37, %v495_v37 }
 0x1af   : > { %v749_v44 = vpack.c.bf16 %v493_v38, %v493_v38  ;;  %v748_v45 = vpack.c.bf16 %v491_v41, %v491_v41 }
 0x1b0   : > { %v489_v43 = vsel %vm386_vm1, %v488_v39, %v471_v26 }
 0x1b1   : > { %v747_v46 = vpack.c.bf16 %v489_v43, %v489_v43 }
 0x1b3   : > { %1397 = vmatmul.msk.bf16.vlgmr.msrb.gmra.mxu0 %vm755_vm2, %v750_v42 }
 0x1b4   : > { %1396 = vmatmul.msk.bf16.vlgmr.msra.gmra.mxu3 %vm755_vm2, %v749_v44 }
 0x1b5   : > { %1395 = vmatmul.msk.bf16.vlgmr.msra.gmra.mxu2 %vm755_vm2, %v748_v45  ;;  %1394 = vmatmul.msk.bf16.vlgmr.msra.gmra.mxu1 %vm755_vm2, %v747_v46 }
 0x230   : > { %v828_v47 = vpop.f32.mrf.mxu0 }
 0x231   : > { %v841_v48 = vsel %vm755_vm2, %v828_v47, -inf }
 0x232   : > { %842 = vmax.xlane.f32.xlu2 %v841_v48  ;;  %v771_v49 = vpop.f32.mrf.mxu1 }
 0x233   : > { %v832_v50 = vsel %vm755_vm2, %v771_v49, -inf }
 0x234   : > { %833 = vmax.xlane.f32.xlu1 %v832_v50 }
 0x237   : > { %v809_v51 = vpop.f32.mrf.mxu3 }
 0x238   : > { %v790_v52 = vpop.f32.mrf.mxu2  ;;  %v830_v53 = vpop.f32.mrf.mxu0  ;;  %v838_v54 = vsel %vm755_vm2, %v809_v51, -inf }
 0x239   : > { %v835_v55 = vsel %vm755_vm2, %v790_v52, -inf }
 0x23a   : > { %839 = vmax.xlane.f32.xlu2 %v838_v54  ;;  %836 = vmax.xlane.f32.xlu0 %v835_v55  ;;  %v773_v56 = vpop.f32.mrf.mxu1 }
 0x23f   : > { %v811_v57 = vpop.f32.mrf.mxu3 }
 0x240   : > { %v792_v58 = vpop.f32.mrf.mxu2 }
 0x24e   : > { %1541 = vrot.lane.b32.xlu0 %v1860_v13, %s1715_s20 }
 0x252   : > { %1536 = vrot.lane.b32.xlu2 %v1857_v10, %s1715_s20  ;;  %s1293_s20 = sshll.u32 %s1289_s13, 4  ;;  %s1294_s20 = int_to_ptr.hbm [resolvable:$true] %s1293_s20 }
 0x2a5   : > { %v843_v59 = vpop.xlane.xlu2 %842 }
 0x2a6   : > { %v847_v60 = vsub.f32 %v828_v47, %v843_v59 }
 0x2a7   : > { %v834_v13 = vpop.xlane.xlu1 %833 }
 0x2a8   : > { %v854_v61 = vmul.f32 1.442695, %v847_v60  ;;  %v844_v10 = vsub.f32 %v771_v49, %v834_v13 }
 0x2aa   : > { %1547 = vpow2.f32 %v854_v61  ;;  %v848_v11 = vmul.f32 1.442695, %v844_v10 }
 0x2ad   : > { %v840_v62 = vpop.xlane.xlu2 %839  ;;  %v837_v63 = vpop.xlane.xlu0 %836 }
 0x2ae   : > { %v846_v0 = vsub.f32 %v809_v51, %v840_v62  ;;  %v845_v4 = vsub.f32 %v790_v52, %v837_v63 }
 0x2b0   : > { %v1961_v1 = vpop.eup %1547  ;;  %v852_v3 = vmul.f32 1.442695, %v846_v0  ;;  %v850_v6 = vmul.f32 1.442695, %v845_v4 }
 0x2b1   : > { %v865_v5 = vsel %vm755_vm2, %v1961_v1, 0.0 }
 0x2b2   : > { %1549 = vpow2.f32 %v852_v3  ;;  %866 = vadd.xlane.f32.xlu0 %v865_v5 }
 0x2b3   : > { %1551 = vpow2.f32 %v850_v6 }
 0x2b4   : > { %1553 = vpow2.f32 %v848_v11 }
 0x2b5   : > { %v1537_v8 = vpop.permute.xlu2 %1536 }
 0x2b6   : > { %v1539_v12 = vunpack.i.h.bf16 %v1537_v8  ;;  %v1538_v14 = vunpack.i.l.bf16 %v1537_v8 }
 0x2b8   : > { %v1965_v7 = vpop.eup %1549  ;;  %v651_v16 = vrot.slane %v1539_v12, 4  ;;  %v639_v18 = vrot.slane %v1538_v14, 4 }
 0x2b9   : > { %v862_v9 = vsel %vm755_vm2, %v1965_v7, 0.0  ;;  %v1969_v15 = vpop.eup %1551 }
 0x2ba   : > { %863 = vadd.xlane.f32.xlu1 %v862_v9  ;;  %v859_v22 = vsel %vm755_vm2, %v1969_v15, 0.0  ;;  %v1979_v31 = vpop.eup %1553 }
 0x2bb   : > { %v856_v43 = vsel %vm755_vm2, %v1979_v31, 0.0 }
 0x2c0   : > { %v1542_v17 = vpop.permute.xlu0 %1541 }
 0x2c1   : > { %v1544_v19 = vunpack.i.h.bf16 %v1542_v17  ;;  %v1543_v21 = vunpack.i.l.bf16 %v1542_v17 }
 0x2c2   : > { %860 = vadd.xlane.f32.xlu1 %v859_v22 }
 0x2c3   : > { %v649_v23 = vrot.slane %v1544_v19, 4  ;;  %v652_v24 = vsel %vm386_vm1, %v1544_v19, %v651_v16  ;;  %v637_v25 = vrot.slane %v1543_v21, 4  ;;  %v640_v26 = vsel %vm386_vm1, %v1543_v21, %v639_v18 }
 0x2c4   : > { %v660_v27 = vperm.slane %v652_v24, %v1863_v20  ;;  %v648_v28 = vperm.slane %v640_v26, %v1863_v20 }
 0x2c5   : > { %v650_v29 = vsel %vm386_vm1, %v649_v23, %v1539_v12  ;;  %v638_v30 = vsel %vm386_vm1, %v637_v25, %v1538_v14 }
 0x2c6   : > { %v656_v32 = vperm.slane %v650_v29, %v1863_v20  ;;  %v673_v33 = vrot.slane %v660_v27, 4  ;;  %v644_v34 = vperm.slane %v638_v30, %v1863_v20  ;;  %v675_v35 = vrot.slane %v648_v28, 4 }
 0x2c8   : > { %v661_v36 = vrot.slane %v656_v32, 4  ;;  %v663_v37 = vrot.slane %v644_v34, 4  ;;  %v674_v38 = vsel %vm386_vm1, %v673_v33, %v648_v28  ;;  %v676_v39 = vsel %vm386_vm1, %v660_v27, %v675_v35 }
 0x2c9   : > { %v680_v41 = vperm.slane %v674_v38, %v1872_v40  ;;  %v684_v42 = vperm.slane %v676_v39, %v1872_v40 }
 0x2ca   : > { %v662_v44 = vsel %vm386_vm1, %v661_v36, %v644_v34  ;;  %v664_v45 = vsel %vm386_vm1, %v656_v32, %v663_v37  ;;  %857 = vadd.xlane.f32.xlu1 %v856_v43 }
 0x2cb   : > { %v668_v46 = vperm.slane %v662_v44, %v1872_v40  ;;  %v672_v47 = vperm.slane %v664_v45, %v1872_v40  ;;  %v689_v48 = vrot.slane %v680_v41, 4  ;;  %v691_v49 = vrot.slane %v684_v42, 4 }
 0x2cd   : > { %v685_v50 = vrot.slane %v668_v46, 4  ;;  %v687_v51 = vrot.slane %v672_v47, 4  ;;  %v692_v52 = vsel %vm386_vm1, 0.0, %v691_v49  ;;  %v704_v53 = vsel %vm386_vm1, %v691_v49, %v680_v41 }
 0x2ce   : > { %v709_v54 = vrot.slane %v692_v52, 4  ;;  %v690_v56 = vsel %vm386_vm1, 0.0, %v689_v48  ;;  %v708_v58 = vperm.slane %v704_v53, %v1863_v20 }
 0x2cf   : > { %v688_v55 = vsel %vm386_vm1, 0.0, %v687_v51  ;;  %v693_v57 = vsel %vm386_vm1, %v687_v51, %v668_v46  ;;  %v686_v62 = vsel %vm386_vm1, 0.0, %v685_v50 }
 0x2d0   : > { %v698_v59 = vrot.slane %v688_v55, 4  ;;  %v697_v60 = vperm.slane %v693_v57, %v1863_v20  ;;  %v710_v61 = vsel %vm386_vm1, %v709_v54, %v690_v56  ;;  %v729_v0 = vrot.slane %v708_v58, 4 }
 0x2d1   : > { %v714_v63 = vperm.slane %v710_v61, %v1863_v20 }
 0x2d2   : > { %v699_v3 = vsel %vm386_vm1, %v698_v59, %v686_v62  ;;  %v717_v4 = vrot.slane %v697_v60, 4 }
 0x2d3   : > { %v703_v5 = vperm.slane %v699_v3, %v1863_v20  ;;  %v730_v6 = vsel %vm386_vm1, %v714_v63, %v729_v0  ;;  %v727_v13 = vrot.slane %v714_v63, 4 }
 0x2d4   : > { %v738_v10 = vperm.slane %v730_v6, %v1872_v40 }
 0x2d5   : > { %v718_v8 = vsel %vm386_vm1, %v703_v5, %v717_v4  ;;  %v715_v9 = vrot.slane %v703_v5, 4  ;;  %v728_v11 = vsel %vm386_vm1, %v727_v13, %v708_v58 }
 0x2d6   : > { %v726_v12 = vperm.slane %v718_v8, %v1872_v40  ;;  %v743_v14 = vrot.slane %v738_v10, 4  ;;  %v734_v16 = vperm.slane %v728_v11, %v1872_v40 }
 0x2d7   : > { %v716_v17 = vsel %vm386_vm1, %v715_v9, %v697_v60 }
 0x2d8   : > { %v744_v18 = vsel %vm386_vm1, %v743_v14, %v726_v12  ;;  %v745_v19 = vrot.slane %v726_v12, 4  ;;  %v722_v21 = vperm.slane %v716_v17, %v1872_v40  ;;  %v739_v22 = vrot.slane %v734_v16, 4 }
 0x2d9   : > { %v882_v23 = vpack.c.bf16 %v744_v18, %v744_v18 }
 0x2da   : > { %v740_v24 = vsel %vm386_vm1, %v739_v22, %v722_v21  ;;  %v746_v25 = vsel %vm386_vm1, %v738_v10, %v745_v19  ;;  %v741_v26 = vrot.slane %v722_v21, 4 }
 0x2db   : > { %v927_v27 = vsel %vm887_vm3, %v882_v23, 0  ;;  %v880_v28 = vpack.c.bf16 %v740_v24, %v740_v24  ;;  %v883_v29 = vpack.c.bf16 %v746_v25, %v746_v25 }
 0x2dc   : > { %936 = vmatpush.bf16.msrb.mxu3 %v927_v27  ;;  %v742_v30 = vsel %vm386_vm1, %v734_v16, %v741_v26 }
 0x2dd   : > { %v889_v32 = vsel %vm887_vm3, %v880_v28, 0  ;;  %v946_v33 = vsel %vm887_vm3, %v883_v29, 0  ;;  %v881_v34 = vpack.c.bf16 %v742_v30, %v742_v30 }
 0x2de   : > { %898 = vmatpush.bf16.msrb.mxu1 %v889_v32  ;;  %955 = vmatpush.bf16.msra.mxu0 %v946_v33 }
 0x2df   : > { %v908_v35 = vsel %vm887_vm3, %v881_v34, 0 }
 0x2e0   : > { %917 = vmatpush.bf16.msrb.mxu2 %v908_v35 }
 0x325   : > { %v867_v36 = vpop.xlane.xlu0 %866 }
 0x326   : > { %1555 = vrcp.f32 %v867_v36 }
 0x32c   : > { %v1556_v37 = vpop.eup %1555 }
 0x32d   : > { %v875_v38 = vmul.f32 %v1556_v37, %v1961_v1  ;;  %v864_v39 = vpop.xlane.xlu1 %863 }
 0x32e   : > { %1557 = vrcp.f32 %v864_v39 }
 0x32f   : > { %v879_v41 = vpack.c.bf16 %v875_v38, %v875_v38 }
 0x331   : > { %1401 = vmatmul.msk.bf16.vlgmr.msra.gmra.mxu0 %vm755_vm2, %v879_v41 }
 0x334   : > { %v1558_v42 = vpop.eup %1557 }
 0x335   : > { %v874_v43 = vmul.f32 %v1558_v42, %v1965_v7  ;;  %v861_v44 = vpop.xlane.xlu1 %860 }
 0x336   : > { %1559 = vrcp.f32 %v861_v44 }
 0x337   : > { %v878_v45 = vpack.c.bf16 %v874_v43, %v874_v43 }
 0x339   : > { %1400 = vmatmul.msk.bf16.vlgmr.msrb.gmra.mxu3 %vm755_vm2, %v878_v45 }
 0x33c   : > { %v1560_v46 = vpop.eup %1559 }
 0x33d   : > { %v873_v47 = vmul.f32 %v1560_v46, %v1969_v15  ;;  %v858_v48 = vpop.xlane.xlu1 %857 }
 0x33e   : > { %1561 = vrcp.f32 %v858_v48 }
 0x33f   : > { %v877_v49 = vpack.c.bf16 %v873_v47, %v873_v47 }
 0x341   : > { %1399 = vmatmul.msk.bf16.vlgmr.msrb.gmra.mxu2 %vm755_vm2, %v877_v49 }
 0x344   : > { %v1562_v1 = vpop.eup %1561 }
 0x345   : > { %v872_v50 = vmul.f32 %v1562_v1, %v1979_v31 }
 0x347   : > { %v876_v51 = vpack.c.bf16 %v872_v50, %v872_v50 }
 0x349   : > { %1398 = vmatmul.msk.bf16.vlgmr.msrb.gmra.mxu1 %vm755_vm2, %v876_v51 }
 0x3ae   : > { %v957_v7 = vpop.f32.mrf.mxu0 }
 0x3af   : > { %v973_v54 = vrot.slane %v957_v7, 4 }
 0x3b6   : > { %v959_v52 = vpop.f32.mrf.mxu0 }
 0x3bc   : > { %v938_v53 = vpop.f32.mrf.mxu3 }
 0x3bd   : > { %v961_v57 = vrot.slane %v938_v53, 4 }
 0x3c4   : > { %v919_v55 = vpop.f32.mrf.mxu2  ;;  %v940_v56 = vpop.f32.mrf.mxu3 }
 0x3c5   : > { %v974_v15 = vsel %vm386_vm1, %v973_v54, %v919_v55  ;;  %v975_v58 = vrot.slane %v919_v55, 4 }
 0x3c6   : > { %v980_v59 = vperm.slane %v974_v15, %v1863_v20  ;;  %v900_v60 = vpop.f32.mrf.mxu1 }
 0x3c7   : > { %v976_v61 = vsel %vm386_vm1, %v957_v7, %v975_v58  ;;  %v962_v31 = vsel %vm386_vm1, %v961_v57, %v900_v60  ;;  %v963_v62 = vrot.slane %v900_v60, 4  ;;  %v1444_v58 = vld [vmem:[%s2147_s3] sm:$0xff] }
 0x3c8   : > { %v984_v63 = vperm.slane %v976_v61, %v1863_v20  ;;  %v985_v0 = vrot.slane %v980_v59, 4  ;;  %v968_v3 = vperm.slane %v962_v31, %v1863_v20 }
 0x3c9   : > { %v964_v4 = vsel %vm386_vm1, %v938_v53, %v963_v62 }
 0x3ca   : > { %v997_v5 = vrot.slane %v984_v63, 4  ;;  %v972_v6 = vperm.slane %v964_v4, %v1863_v20  ;;  %v986_v13 = vsel %vm386_vm1, %v985_v0, %v968_v3  ;;  %v987_v10 = vrot.slane %v968_v3, 4  ;;  %v2077_v3 = vld [vmem:[#allocation2] sm:$0xff] }
 0x3cb   : > { %v992_v8 = vperm.slane %v986_v13, %v1872_v40  ;;  %v1093_v4 = vperm.slane %v2077_v3, 0 }
 0x3cc   : > { %v988_v9 = vsel %vm386_vm1, %v980_v59, %v987_v10  ;;  %v998_v11 = vsel %vm386_vm1, %v997_v5, %v972_v6  ;;  %v999_v12 = vrot.slane %v972_v6, 4  ;;  %v921_v14 = vpop.f32.mrf.mxu2 }
 0x3cd   : > { %v996_v16 = vperm.slane %v988_v9, %v1872_v40  ;;  %v1004_v17 = vperm.slane %v998_v11, %v1872_v40  ;;  %v1009_v22 = vrot.slane %v992_v8, 4  ;;  %v1719_v9 = vmov 32.0  }
 0x3ce   : > { %v1000_v18 = vsel %vm386_vm1, %v984_v63, %v999_v12  ;;  %v902_v19 = vpop.f32.mrf.mxu1  ;;  %1563 = vrcp.f32 %v1719_v9 }
 0x3cf   : > { %v1008_v21 = vperm.slane %v1000_v18, %v1872_v40  ;;  %v1011_v23 = vrot.slane %v996_v16, 4  ;;  %v1013_v25 = vrot.slane %v1004_v17, 4  ;;  %v1010_v30 = vsel %vm386_vm1, 0.0, %v1009_v22  ;;  %v1446_v19 = vld [vmem:[#allocation5] sm:$0xff] }
 0x3d1   : > { %v1012_v24 = vsel %vm386_vm1, 0.0, %v1011_v23  ;;  %v1015_v26 = vrot.slane %v1008_v21, 4  ;;  %v1017_v27 = vsel %vm386_vm1, %v1011_v23, %v992_v8  ;;  %v1014_v37 = vsel %vm386_vm1, 0.0, %v1013_v25 }
 0x3d2   : > { %v1022_v28 = vrot.slane %v1012_v24, 4  ;;  %v1021_v29 = vperm.slane %v1017_v27, %v1863_v20 }
 0x3d3   : > { %v1016_v32 = vsel %vm386_vm1, 0.0, %v1015_v26  ;;  %v1028_v33 = vsel %vm386_vm1, %v1015_v26, %v1004_v17  ;;  %v1447_v17 = vld [vmem:[#allocation5 + $0x8] sm:$0xff] }
 0x3d4   : > { %v1033_v34 = vrot.slane %v1016_v32, 4  ;;  %v1023_v35 = vsel %vm386_vm1, %v1022_v28, %v1010_v30  ;;  %v1032_v36 = vperm.slane %v1028_v33, %v1863_v20  ;;  %v1041_v39 = vrot.slane %v1021_v29, 4  ;;  %v1564_v11 = vpop.eup %1563  ;;  %1179 = vmatpush.bf16.msra.mxu2 %v1447_v17 }
 0x3d5   : > { %v1027_v38 = vperm.slane %v1023_v35, %v1863_v20  ;;  %v1127_v12 = vmul.f32 32.0, %v1564_v11  ;;  %vm1131_vm6 = vweird.f32 %v1564_v11  ;;  %v1146_v32 = vperm.slane %v2077_v3, 2 }
 0x3d6   : > { %v1034_v41 = vsel %vm386_vm1, %v1033_v34, %v1014_v37  ;;  %v1053_v42 = vrot.slane %v1032_v36, 4 }
 0x3d7   : > { %v1038_v43 = vperm.slane %v1034_v41, %v1863_v20  ;;  %v1039_v44 = vrot.slane %v1027_v38, 4  ;;  %v1042_v45 = vsel %vm386_vm1, %v1027_v38, %v1041_v39  ;;  %v1128_v14 = vsub.f32 1.0, %v1127_v12  ;;  %v1451_v38 = vld [vmem:[%s2151_s7 + $0x18] sm:$0xff]  ;;  %v1450_v39 = vld [vmem:[%s2151_s7 + $0x10] sm:$0xff]  ;;  %v1449_v41 = vld [vmem:[%s2151_s7 + $0x8] sm:$0xff] }
 0x3d8   : > { %v1050_v51 = vperm.slane %v1042_v45, %v1872_v40  ;;  %1180 = vmatpush.bf16.msra.mxu2 %v1446_v19  ;;  %1248 = vmatpush.bf16.msra.mxu3 %v1451_v38 }
 0x3d9   : > { %v1054_v46 = vsel %vm386_vm1, %v1038_v43, %v1053_v42  ;;  %v1040_v47 = vsel %vm386_vm1, %v1039_v44, %v1021_v29  ;;  %v1051_v48 = vrot.slane %v1038_v43, 4  ;;  %v1129_v16 = vmul.f32 %v1564_v11, %v1128_v14  ;;  %v1448_v44 = vld [vmem:[%s2151_s7] sm:$0xff] }
 0x3da   : > { %v1062_v49 = vperm.slane %v1054_v46, %v1872_v40  ;;  %v1046_v1 = vperm.slane %v1040_v47, %v1872_v40  ;;  %v1069_v57 = vrot.slane %v1050_v51, 4 }
 0x3db   : > { %v1052_v50 = vsel %vm386_vm1, %v1051_v48, %v1032_v36  ;;  %v1130_v18 = vadd.f32 %v1564_v11, %v1129_v16 }
 0x3dc   : > { %v1067_v7 = vrot.slane %v1062_v49, 4  ;;  %v1058_v52 = vperm.slane %v1052_v50, %v1872_v40  ;;  %v1065_v20 = vrot.slane %v1046_v1, 4  ;;  %v1070_v15 = vsel %vm386_vm1, %v1062_v49, %v1069_v57  ;;  %v1445_v40 = vld [vmem:[%s2147_s3 + $0x8] sm:$0xff]  ;;  %1249 = vmatpush.bf16.msra.mxu3 %v1450_v39 }
 0x3dd   : > { %1115 = vmatpush.bf16.msra.mxu1 %v1445_v40  ;;  %v2081_v21 = vsel %vm1131_vm6, %v1564_v11, %v1130_v18 }
 0x3de   : > { %v1068_v53 = vsel %vm386_vm1, %v1067_v7, %v1050_v51  ;;  %v1063_v54 = vrot.slane %v1058_v52, 4  ;;  %v1066_v55 = vsel %vm386_vm1, %v1058_v52, %v1065_v20 }
 0x3df   : > { %1076 = vrot.lane.b32.xlu1 %v1068_v53, %s1716_s17  ;;  %1072 = vrot.lane.b32.xlu2 %v1066_v55, %s1717_s21  ;;  %s1647_s17 = sshra.s32 %s1294_s20, 4  ;;  %s1648_s17 = int_to_ptr.hbm [resolvable:$true] %s1647_s17 }
 0x3e0   : > { %v1064_v56 = vsel %vm386_vm1, %v1063_v54, %v1046_v1  ;;  %1250 = vmatpush.bf16.msra.mxu3 %v1449_v41  ;;  %s1649_s21 = scalar_lea.hbm %s1648_s17, 8  ;;  %p1654_p3 = scmp.lt.s32.totalorder %s1648_s17, %s2152_s8 }
 0x3e1   : > { %1116 = vmatpush.bf16.msra.mxu1 %v1444_v58  ;;  %p1650_p0 = scmp.ne.s32.totalorder %s1648_s17, %s1649_s21  ;;  %p1655_p4 = scmp.lt.s32.totalorder %s1653_s25, %s1649_s21 }
 0x3e3   : > { %p1651_p1 = pnand %p1650_p0, %p1803_p5  ;;  %p1656_p7 = por %p1655_p4, %p1654_p3 }
 0x3e4   : > { %1251 = vmatpush.bf16.msra.mxu3 %v1448_v44 }
 0x3e5   : > { %p1652_p2 = pneg %p1651_p1 }
 0x3e7   : > { %1080 = vrot.lane.b32.xlu2 %v1070_v15, %s1718_s22  ;;  %v1215_v15 = vperm.slane %v2077_v3, 1  ;;  %p1657_p8 = pnand %p1656_p7, %p1652_p2 }
 0x439   : > { %v1073_v59 = vpop.permute.xlu2 %1072 }
 0x43a   : > { %v1083_v60 = vsel %vm755_vm2, %v1064_v56, %v1073_v59 }
 0x441   : > { %v1081_v31 = vpop.permute.xlu2 %1080 }
 0x451   : > { %v1077_v61 = vpop.permute.xlu1 %1076 }
 0x452   : > { %v1085_v62 = vsel %vm1084_vm4, %v1083_v60, %v1077_v61 }
 0x453   : > { %v1087_v63 = vsel %vm1086_vm5, %v1085_v62, %v1081_v31 }
 0x454   : > { %v1088_v0 = vpack.c.bf16 %v1087_v63, %v1087_v63 }
 0x456   : > { %1410 = vmatmul.msk.bf16.vlgmr.msra.gmra.mxu1 %vm357_vm0, %v1088_v0 }
 0x4d3   : > { %v1118_v5 = vpop.f32.mrf.mxu1 }
 0x4d4   : > { %v1119_v6 = vadd.f32 %v1118_v5, %v1093_v4 }
 0x4d6   : > { %v1122_v13 = vmul.f32 %v1119_v6, %v1119_v6 }
 0x4d8   : > { %v1123_v10 = vsel %vm357_vm0, %v1122_v13, 0.0 }
 0x4d9   : > { %1124 = vadd.xlane.f32.xlu2 %v1123_v10 }
 0x4db   : > { %v1120_v8 = vpop.f32.mrf.mxu1 }
 0x4dc   : > { %v1274_v8 = vperm.slane %v2077_v3, 3 }
 0x54c   : > { %v1125_v22 = vpop.xlane.xlu2 %1124 }
 0x54d   : > { %v1133_v23 = vmul.f32 %v2081_v21, %v1125_v22 }
 0x54f   : > { %v1134_v24 = vadd.f32 1e-06, %v1133_v23 }
 0x551   : > { %1565 = vrsqrt.f32 %v1134_v24  ;;  %vm1141_vm8 = vweird.f32 %v1134_v24 }
 0x557   : > { %v1566_v25 = vpop.eup %1565 }
 0x558   : > { %v1136_v26 = vmul.f32 %v1566_v25, %v1134_v24  ;;  %vm1142_vm7 = vweird.f32 %v1566_v25 }
 0x559   : > { %vm1143_vm9 = vmor %vm1141_vm8, %vm1142_vm7 }
 0x55a   : > { %v1137_v27 = vmul.f32 %v1566_v25, %v1136_v26 }
 0x55c   : > { %v1138_v28 = vmul.f32 0.5, %v1137_v27 }
 0x55e   : > { %v1139_v29 = vsub.f32 1.5, %v1138_v28 }
 0x560   : > { %v1140_v30 = vmul.f32 %v1566_v25, %v1139_v29 }
 0x562   : > { %v1144_v33 = vsel %vm1143_vm9, %v1566_v25, %v1140_v30 }
 0x563   : > { %v1145_v34 = vmul.f32 %v1144_v33, %v1119_v6 }
 0x565   : > { %v1147_v35 = vmul.f32 %v1146_v32, %v1145_v34 }
 0x567   : > { %v2086_v36 = vadd.f32 %v1147_v35, %v1849_v2  ;;  %v1546_v2 = vld [vmem:[%s2150_s6] ss:$0 sm:$0xff] }
 0x569   : > { %v1149_v37 = vpack.c.bf16 %v2086_v36, %v2086_v36 }
 0x56b   : > { %1419 = vmatmul.msk.bf16.vlgmr.msra.gmra.mxu2 %vm357_vm0, %v1149_v37 }
 0x5ee   : > { %v1182_v42 = vpop.f32.mrf.mxu2 }
 0x5ef   : > { %v1183_v43 = vadd.f32 %v1546_v2, %v1182_v42 }
 0x5f1   : > { %v1420_v45 = vmul.f32 -1.442695, %v1183_v43 }
 0x5f3   : > { %1567 = vpow2.f32 %v1420_v45 }
 0x5f6   : > { %v1184_v46 = vpop.f32.mrf.mxu2 }
 0x5f9   : > { %v1568_v47 = vpop.eup %1567 }
 0x5fa   : > { %v1189_v48 = vadd.f32 1.0, %v1568_v47 }
 0x5fc   : > { %1569 = vrcp.f32 %v1189_v48  ;;  %v1201_v51 = vand.u32 2147483648, %v1189_v48  ;;  %v1199_v52 = vand.u32 2147483647, %v1189_v48  ;;  %vm1195_vm11 = vweird.f32 %v1189_v48 }
 0x5fe   : > { %v1202_v53 = vor.u32 1.1754944e-38, %v1201_v51  ;;  %vm1200_vm13 = vcmp.eq.f32.partialorder %v1199_v52, 8.507059e+37 }
 0x602   : > { %v1570_v49 = vpop.eup %1569 }
 0x603   : > { %v1191_v1 = vmul.f32 %v1570_v49, %v1189_v48  ;;  %vm1196_vm10 = vweird.f32 %v1570_v49 }
 0x604   : > { %vm1197_vm12 = vmor %vm1195_vm11, %vm1196_vm10 }
 0x605   : > { %v1192_v50 = vsub.f32 1.0, %v1191_v1 }
 0x607   : > { %v1193_v7 = vmul.f32 %v1570_v49, %v1192_v50 }
 0x609   : > { %v1194_v20 = vadd.f32 %v1570_v49, %v1193_v7 }
 0x60b   : > { %v1198_v54 = vsel %vm1197_vm12, %v1570_v49, %v1194_v20 }
 0x60c   : > { %v1203_v55 = vsel %vm1200_vm13, %v1202_v53, %v1198_v54 }
 0x60d   : > { %v1205_v56 = vmul.f32 %v1203_v55, %v1183_v43 }
 0x60f   : > { %v1206_v57 = vpack.c.bf16 %v1205_v56, %v1205_v56 }
 0x611   : > { %1437 = vmatmul.msk.bf16.vlgmr.msra.gmra.mxu3 %vm1240_vm14, %v1206_v57 }
 0x694   : > { %v1253_v40 = vpop.f32.mrf.mxu3 }
 0x695   : > { %v1254_v58 = vadd.f32 %v1253_v40, %v1215_v15 }
 0x697   : > { %v1257_v59 = vmul.f32 %v1254_v58, %v1254_v58 }
 0x699   : > { %v1258_v60 = vsel %vm357_vm0, %v1257_v59, 0.0 }
 0x69a   : > { %1259 = vadd.xlane.f32.xlu1 %v1258_v60 }
 0x69c   : > { %v1255_v61 = vpop.f32.mrf.mxu3 }
 0x70d   : > { %v1260_v31 = vpop.xlane.xlu1 %1259 }
 0x70e   : > { %v1261_v62 = vmul.f32 %v1260_v31, %v2081_v21 }
 0x710   : > { %v1262_v63 = vadd.f32 1e-06, %v1261_v62 }
 0x712   : > { %1571 = vrsqrt.f32 %v1262_v63  ;;  %vm1269_vm1 = vweird.f32 %v1262_v63 }
 0x718   : > { %v1572_v0 = vpop.eup %1571 }
 0x719   : > { %v1264_v4 = vmul.f32 %v1572_v0, %v1262_v63  ;;  %vm1270_vm15 = vweird.f32 %v1572_v0 }
 0x71a   : > { %vm1271_vm2 = vmor %vm1269_vm1, %vm1270_vm15 }
 0x71b   : > { %v1265_v5 = vmul.f32 %v1572_v0, %v1264_v4 }
 0x71d   : > { %v1266_v6 = vmul.f32 0.5, %v1265_v5 }
 0x71f   : > { %v1267_v13 = vsub.f32 1.5, %v1266_v6 }
 0x721   : > { %v1268_v10 = vmul.f32 %v1572_v0, %v1267_v13 }
 0x723   : > { %v1272_v9 = vsel %vm1271_vm2, %v1572_v0, %v1268_v10 }
 0x724   : > { %v1273_v11 = vmul.f32 %v1272_v9, %v1254_v58 }
 0x726   : > { %v1275_v12 = vmul.f32 %v1274_v8, %v1273_v11 }
 0x728   : > { %v1276_v14 = vadd.f32 %v1275_v12, %v2086_v36 }
 0x72a   : > { %1277 = vst.msk [vmem:[%s328_s18] sm:$0xff] %vm357_vm0, %v1276_v14 }
 0x72b   : > { %1660 = shalt.err (!%p1657_p8)
}
 0x72c   : > { %1460 = dma.vmem_to_hbm [thread:$0]  (%p1803_p5), %s1292_s19, 128, %s1294_s20, %s1279_s9  }
 0x72d PF: > { %p1477_p9 = scmp.ge.s32.totalorder %s1703_s30, 2  ;;  %s1305_s24 = sand.u32 1, %s1691_s27  }
 0x72e   : > { %s1306_s12 = scalar_lea.sflag [#allocation4], %s1305_s24 }
 0x72f   : > { %p1470_p10 = pnand %p1477_p9, %p1807_p6 }
 0x731   : > { %p1471_p11 = pneg %p1470_p10 }
 0x733   : > { %1686 = dma.done.wait (%p1471_p11), %s1306_s12, 128  }
 0x734   : > { %1688 = vsyncadd (%p1471_p11), %s1306_s12, 4294967168  ;;  %p20_p12 = scmp.ge.s32.totalorder %s1790_s11, 4   ;;  %s2156_s27 = smov %s1695_s28 }
 0x735   : > { %s2157_s28 = smov %s1699_s29  ;;  %s2158_s29 = smov %s1801_s14 }
 0x736   : > { %s2159_s30 = smov %s1790_s11  ;;  %22 = sbr.rel (!%p20_p12) target bundleno = 5 (0x5), region = 96 }
 0x73b   :  { %1312 = vsyncpa [#allocation3], 1 }
 0x73c   :  { %1314 = vsyncpa [#allocation3 + $0x1], 1 }
 0x73d   :  { %1315 = vsyncpa [#allocation6], 1 }
 0x73e   :  { %1316 = vsyncpa [#allocation4], 1 }
 0x73f   :  { %1318 = vsyncpa [#allocation4 + $0x1], 1 }

// kernel: tpu_custom_call.1
= control target key start
LH: loop header
LB: loop body
LE: loop exit
PB: predicated region body
PF: predicated region fallthrough
CT: control target
= control target key end

     0   :  { %13 = vsyncpa [#allocation3], 0  ;;  %s1490_s0 = inlined_call_operand.vmem [shape: f32[2,8,32], index: 0, kind: input, shape index: {}]   ;;  %s1491_s1 = inlined_call_operand.vmem [shape: bf16[32,96], index: 1, kind: input, shape index: {}]   ;;  %s1492_s2 = inlined_call_operand.vmem [shape: f32[1,96], index: 2, kind: input, shape index: {}]   ;;  %s1493_s3 = inlined_call_operand.vmem [shape: bf16[32,32], index: 3, kind: input, shape index: {}]   ;;  %s1494_s4 = inlined_call_operand.hbm [shape: f32[8,32], index: 4, kind: input, shape index: {}]   ;;  %s1495_s5 = inlined_call_operand.hbm [shape: bf16[32,64], index: 5, kind: input, shape index: {}]   ;;  %s1496_s6 = inlined_call_operand.vmem [shape: f32[1,64], index: 6, kind: input, shape index: {}]   ;;  %s1497_s7 = inlined_call_operand.vmem [shape: bf16[64,32], index: 7, kind: input, shape index: {}]   ;;  %s1498_s8 = inlined_call_operand.hbm [shape: f32[2,8,32], index: 8, kind: output, shape index: {}]  }
   0x1   :  { %14 = vsyncpa [#allocation6], 0 }
   0x2   :  { %15 = vsyncpa [#allocation4], 0 }
   0x3   :  { %17 = vsyncpa [#allocation4 + $0x1], 0  ;;  %s1289_s27 = smov 0   ;;  %s1291_s28 = smov 0  }
   0x4   :  { %s1293_s29 = smov 0   ;;  %s1295_s30 = smov 0  }
   0x5 LB: > { %s1310_s9 = sadd.s32 4294967295, %s1223_s30   ;;  %s911_s10 = sadd.s32 4294967294, %s1223_s30   ;;  %s1223_s30 = sphi %s1295_s30, %s1505_s30   ;;  %s1219_s29 = sphi %s1293_s29, %s1504_s29   ;;  %s1215_s28 = sphi %s1291_s28, %s1503_s28   ;;  %s1211_s27 = sphi %s1289_s27, %s1502_s27  }
   0x6   : > { %s1314_s11 = sadd.s32 1, %s1223_s30   ;;  %s203_s12 = sadd.s32 1, %s1219_s29 }
   0x7   : > { %s200_s13 = ssub.s32 %s1223_s30, %s1314_s11  ;;  %p213_p0 = scmp.ne.s32.totalorder %s1219_s29, %s1215_s28 }
   0x8   : > { %p201_p1 = scmp.eq.s32.totalorder %s200_s13, 0  ;;  %p214_p2 = scmp.eq.s32.totalorder %s1310_s9, 1 }
   0x9   : > { %p219_p3 = scmp.ne.s32.totalorder %s1215_s28, %s1211_s27  ;;  %p220_p4 = scmp.eq.s32.totalorder %s911_s10, 1 }
   0xa   : > { %s1325_s14 = scalar_select %p201_p1, %s1219_s29, %s203_s12  }
   0xb   : > { %p1327_p5 = por %p214_p2, %p213_p0  ;;  %p1331_p6 = por %p220_p4, %p219_p3 }
   0xc   : > { %p912_p7 = scmp.ge.s32.totalorder %s1223_s30, 1  ;;  %p227_p8 = scmp.lt.s32.totalorder %s1223_s30, 3 }
   0xd   : > { %p1009_p9 = scmp.eq.s32.totalorder %s1310_s9, 0  ;;  %s248_s20 = sshll.u32 %s1494_s4, 4  ;;  %s249_s20 = int_to_ptr.hbm [resolvable:$true] %s248_s20 }
   0xe   : > { %p1338_p10 = pnand %p912_p7, %p227_p8  ;;  %s1225_s21 = smov [#allocation2]  }
   0xf   : > { %s250_s22 = sshll.u32 %s1225_s21, 4  ;;  %s259_s25 = sshll.u32 %s1495_s5, 4  ;;  %s251_s22 = int_to_ptr.vmem [resolvable:$true] %s250_s22  ;;  %s260_s25 = int_to_ptr.hbm [resolvable:$true] %s259_s25 }
  0x10   : > { %p998_p11 = pneg %p1338_p10  ;;  %s1226_s26 = smov [#allocation5]  }
  0x11   : > { %s261_s10 = sshll.u32 %s1226_s26, 4  ;;  %s1227_s12 = smov 64   ;;  %s262_s10 = int_to_ptr.vmem [resolvable:$true] %s261_s10 }
  0x12   : > { %p999_p12 = pnand %p1009_p9, %p998_p11  ;;  %s1228_s13 = smov 4  }
  0x13   : > { %290 = sbr.rel (%p1338_p10) target bundleno = 1692 (0x69c), region = 52 }
  0x14   : > { %1001 = dma.hbm_to_vmem [thread:$0]  (!%p999_p12), %s249_s20, 128, %s251_s22, [#allocation3]  }
  0x15   : > { %1004 = dma.hbm_to_vmem [thread:$0]  (!%p999_p12), %s260_s25, 256, %s262_s10, [#allocation6], %s1227_s12, %s1227_s12, %s1228_s13  }
  0x18   : > { %1198 = dma.done.wait (%p1009_p9), [#allocation3], 128  }
  0x19   : > { %1200 = vsyncadd (%p1009_p9), [#allocation3], 4294967168 }
  0x1a   : > { %1202 = dma.done.wait (%p1009_p9), [#allocation6], 256  }
  0x1b   : > { %1204 = vsyncadd (%p1009_p9), [#allocation6], 4294967040  ;;  %p329_p13 = scmp.lt.s32.totalorder %s1310_s9, 1  ;;  %v979_v0 = vld [vmem:[%s1491_s1 + $0x8] sm:$0xff]  ;;  %v978_v1 = vld [vmem:[%s1491_s1] sm:$0xff]  ;;  %vm357_vm0 = vcmask 261120  }
  0x1c   : > { %367 = vmatpush.bf16.msra.mxu0 %v979_v0  ;;  %v1065_v4 = vld [vmem:[%s1492_s2] ss:$0 sm:$0xff]  ;;  %s1229_s12 = smov 96   ;;  %s1230_s13 = smov 104   ;;  %vm382_vm1 = vcmask 64512   ;;  %vm419_vm2 = vcmask 1043456  }
  0x1d   : > { %s330_s18 = scalar_select %p329_p13, %s1310_s9, 1  ;;  %vm620_vm3 = vcmask 130048   ;;  %vm622_vm4 = vcmask 195584   ;;  %vm776_vm13 = vcmask 523264  }
  0x1e   : > { %s1233_s20 = smov 80   ;;  %s1234_s17 = smov 72  }
  0x1f   : > { %s920_s19 = sshll.u32 %s330_s18, 3  ;;  %s1231_s18 = smov 120  }
  0x20   : > { %s332_s21 = scalar_lea.vmem %s1490_s0, %s920_s19  ;;  %368 = vmatpush.bf16.msra.mxu0 %v978_v1  ;;  %s1232_s19 = smov 88  }
  0x21   : > { %v1373_v2 = vld [vmem:[%s332_s21] sm:$0xff]  ;;  %s1235_s21 = smov 112   ;;  %s1236_s22 = smov 64  }
  0x22   : > { %v335_v3 = vpack.c.bf16 %v1373_v2, %v1373_v2  ;;  %s1237_s23 = smov 40   ;;  %s1238_s24 = smov 56  }
  0x23   : > { %s1239_s25 = smov 48   ;;  %s1240_s26 = smov 8  }
  0x24   : > { %929 = vmatmul.msk.bf16.vlgmr.msra.gmra.mxu0 %vm357_vm0, %v335_v3  ;;  %s1241_s10 = smov 16  }
  0xa1   : > { %v370_v5 = vpop.f32.mrf.mxu0 }
  0xa2   : > { %v371_v6 = vadd.f32 %v1065_v4, %v370_v5 }
  0xa4   : > { %v374_v7 = vmul.f32 0.35355338, %v371_v6  ;;  %v376_v8 = vpack.c.bf16 %v371_v6, %v371_v6 }
  0xa6   : > { %v375_v9 = vpack.c.bf16 %v374_v7, %v374_v7  ;;  %v378_v10 = vunpack.c.l.b16 %v376_v8 }
  0xa8   : > { %v1381_v11 = vpack.c.b16 %v378_v10, %v378_v10  ;;  %v437_v12 = vunpack.c.l.b16 %v375_v9 }
  0xa9   : > { %v372_v13 = vpop.f32.mrf.mxu0 }
  0xaa   : > { %380 = vrot.lane.b32.xlu0 %v1381_v11, %s1229_s12  ;;  %v438_v14 = vpack.c.b16 %v437_v12, %v437_v12  ;;  %s1242_s12 = smov 24  }
  0xac   : > { %551 = vrot.lane.b32.xlu2 %v438_v14, %s1230_s13  ;;  %439 = vrot.lane.b32.xlu1 %v438_v14, %s1231_s18  ;;  %s326_s18 = sand.u32 1, %s1215_s28  }
  0xb2   : > { %441 = vrot.lane.b32.xlu0 %v1381_v11, %s1232_s19  ;;  %s919_s19 = sshll.u32 %s326_s18, 3 }
  0xb4   : > { %497 = vrot.lane.b32.xlu2 %v1381_v11, %s1233_s20  ;;  %553 = vrot.lane.b32.xlu1 %v1381_v11, %s1234_s17  ;;  %s975_s20 = sshll.u32 %s1310_s9, 3  ;;  %s815_s9 = scalar_lea.sflag [#allocation4], %s326_s18 }
  0xba   : > { %495 = vrot.lane.b32.xlu0 %v438_v14, %s1235_s21 }
 0x106   : > { %v552_v15 = vpop.permute.xlu2 %551 }
 0x10e   : > { %v498_v16 = vpop.permute.xlu2 %497 }
 0x10f   : > { %v503_v17 = vsel %vm382_vm1, %v498_v16, 0 }
 0x110   : > { %512 = vmatpush.bf16.xpose.msrb.mxu0 %v503_v17 }
 0x11c   : > { %v381_v18 = vpop.permute.xlu0 %380 }
 0x11d   : > { %v387_v19 = vsel %vm382_vm1, %v381_v18, 0 }
 0x11e   : > { %396 = vmatpush.bf16.xpose.msra.mxu1 %v387_v19  ;;  %v440_v20 = vpop.permute.xlu1 %439 }
 0x124   : > { %v442_v21 = vpop.permute.xlu0 %441 }
 0x125   : > { %930 = vmatmul.msk.bf16.vlgmr.msra.gmra.mxu1 %vm382_vm1, %v375_v9  ;;  %v447_v22 = vsel %vm382_vm1, %v442_v21, 0 }
 0x126   : > { %456 = vmatpush.bf16.xpose.msra.mxu3 %v447_v22  ;;  %v554_v23 = vpop.permute.xlu1 %553 }
 0x127   : > { %v559_v24 = vsel %vm382_vm1, %v554_v23, 0 }
 0x12c   : > { %v496_v25 = vpop.permute.xlu0 %495 }
 0x12d   : > { %932 = vmatmul.msk.bf16.vlgmr.msra.gmra.mxu3 %vm382_vm1, %v440_v20  ;;  %934 = vmatmul.msk.bf16.vlgmr.msrb.gmra.mxu0 %vm382_vm1, %v496_v25 }
 0x12e   : > { %568 = vmatpush.bf16.xpose.msrb.mxu3 %v559_v24 }
 0x13d   : > { %936 = vmatmul.msk.bf16.vlgmr.msrb.gmra.mxu3 %vm382_vm1, %v552_v15 }
 0x1a2   : > { %v398_v26 = vpop.f32.mrf.mxu1 }
 0x1a3   : > { %v402_v27 = vsel %vm382_vm1, %v398_v26, -inf }
 0x1a4   : > { %403 = vmax.xlane.f32.xlu1 %v402_v27  ;;  %v981_v27 = vld [vmem:[%s1493_s3 + $0x8] sm:$0xff] }
 0x1a5   : > { %651 = vmatpush.bf16.msra.mxu0 %v981_v27 }
 0x1aa   : > { %v400_v28 = vpop.f32.mrf.mxu1  ;;  %v514_v29 = vpop.f32.mrf.mxu0 }
 0x1ab   : > { %v518_v34 = vsel %vm382_vm1, %v514_v29, -inf  ;;  %v980_v28 = vld [vmem:[%s1493_s3] sm:$0xff] }
 0x1ac   : > { %652 = vmatpush.bf16.msra.mxu0 %v980_v28 }
 0x1b0   : > { %v458_v30 = vpop.f32.mrf.mxu3 }
 0x1b1   : > { %v462_v31 = vsel %vm382_vm1, %v458_v30, -inf }
 0x1b2   : > { %v516_v32 = vpop.f32.mrf.mxu0  ;;  %463 = vmax.xlane.f32.xlu2 %v462_v31 }
 0x1b8   : > { %v460_v33 = vpop.f32.mrf.mxu3 }
 0x1ba   : > { %519 = vmax.xlane.f32.xlu2 %v518_v34 }
 0x1c0   : > { %v570_v35 = vpop.f32.mrf.mxu3 }
 0x1c1   : > { %v574_v36 = vsel %vm382_vm1, %v570_v35, -inf }
 0x1c2   : > { %575 = vmax.xlane.f32.xlu0 %v574_v36  ;;  %v1423_v36 = vld [vmem:[#allocation2] sm:$0xff] }
 0x1c8   : > { %v572_v37 = vpop.f32.mrf.mxu3 }
 0x1c9   : > { %v629_v37 = vperm.slane %v1423_v36, 0 }
 0x1d2   : > { %414 = vrot.lane.b32.xlu2 %v1381_v11, %s1236_s22  ;;  %s825_s22 = scalar_lea.hbm %s1498_s8, %s975_s20 }
 0x1da   : > { %586 = vrot.lane.b32.xlu2 %v1381_v11, %s1237_s23  ;;  %s328_s23 = scalar_lea.vmem [#allocation7], %s919_s19  ;;  %s1173_s19 = scalar_lea.hbm %s1498_s8, 16 }
 0x217   : > { %v404_v38 = vpop.xlane.xlu1 %403 }
 0x218   : > { %v405_v39 = vsub.f32 %v398_v26, %v404_v38 }
 0x21a   : > { %v406_v40 = vmul.f32 1.442695, %v405_v39 }
 0x21c   : > { %1067 = vpow2.f32 %v406_v40 }
 0x222   : > { %v1068_v41 = vpop.eup %1067 }
 0x223   : > { %v408_v42 = vsel %vm382_vm1, %v1068_v41, 0.0 }
 0x224   : > { %409 = vadd.xlane.f32.xlu1 %v408_v42 }
 0x225   : > { %v464_v43 = vpop.xlane.xlu2 %463 }
 0x226   : > { %v465_v46 = vsub.f32 %v458_v30, %v464_v43  ;;  %v1243_v43 = vmov 32.0  }
 0x228   : > { %v466_v48 = vmul.f32 1.442695, %v465_v46 }
 0x22d   : > { %v520_v44 = vpop.xlane.xlu2 %519 }
 0x22e   : > { %v521_v45 = vsub.f32 %v514_v29, %v520_v44 }
 0x230   : > { %v522_v47 = vmul.f32 1.442695, %v521_v45 }
 0x232   : > { %1069 = vpow2.f32 %v522_v47 }
 0x233   : > { %1071 = vpow2.f32 %v466_v48  ;;  %v983_v48 = vld [vmem:[#allocation5 + $0x8] sm:$0xff] }
 0x235   : > { %v415_v49 = vpop.permute.xlu2 %414  ;;  %v576_v50 = vpop.xlane.xlu0 %575 }
 0x236   : > { %v421_v51 = vsel %vm419_vm2, %v415_v49, 0  ;;  %v577_v53 = vsub.f32 %v570_v35, %v576_v50  ;;  %v982_v50 = vld [vmem:[#allocation5] sm:$0xff] }
 0x237   : > { %430 = vmatpush.bf16.msra.mxu2 %v421_v51 }
 0x238   : > { %v1070_v52 = vpop.eup %1069  ;;  %v578_v55 = vmul.f32 1.442695, %v577_v53 }
 0x239   : > { %v524_v54 = vsel %vm382_vm1, %v1070_v52, 0.0  ;;  %v1072_v56 = vpop.eup %1071 }
 0x23a   : > { %525 = vadd.xlane.f32.xlu0 %v524_v54  ;;  %1073 = vpow2.f32 %v578_v55  ;;  %v468_v57 = vsel %vm382_vm1, %v1072_v56, 0.0 }
 0x23d   : > { %474 = vrot.lane.b32.xlu1 %v1381_v11, %s1238_s24  ;;  %v587_v1 = vpop.permute.xlu2 %586  ;;  %s827_s24 = sshll.u32 %s328_s23, 4  ;;  %s828_s24 = int_to_ptr.vmem [resolvable:$true] %s827_s24 }
 0x23e   : > { %v592_v5 = vsel %vm419_vm2, %v587_v1, 0 }
 0x240   : > { %v1074_v58 = vpop.eup %1073 }
 0x241   : > { %v580_v59 = vsel %vm382_vm1, %v1074_v58, 0.0 }
 0x242   : > { %469 = vadd.xlane.f32.xlu0 %v468_v57 }
 0x24a   : > { %581 = vadd.xlane.f32.xlu0 %v580_v59 }
 0x25e   : > { %530 = vrot.lane.b32.xlu0 %v1381_v11, %s1239_s25  ;;  %s829_s25 = sshll.u32 %s825_s22, 4  ;;  %s830_s25 = int_to_ptr.hbm [resolvable:$true] %s829_s25 }
 0x297   : > { %v410_v60 = vpop.xlane.xlu1 %409 }
 0x298   : > { %1075 = vrcp.f32 %v410_v60 }
 0x29e   : > { %v1076_v61 = vpop.eup %1075 }
 0x29f   : > { %v412_v62 = vmul.f32 %v1076_v61, %v1068_v41  ;;  %v682_v61 = vperm.slane %v1423_v36, 2 }
 0x2a1   : > { %v413_v63 = vpack.c.bf16 %v412_v62, %v412_v62 }
 0x2a3   : > { %931 = vmatmul.msk.bf16.vlgmr.msra.gmra.mxu2 %vm382_vm1, %v413_v63 }
 0x2ad   : > { %v526_v0 = vpop.xlane.xlu0 %525 }
 0x2af   : > { %v475_v3 = vpop.permute.xlu1 %474 }
 0x2b0   : > { %v480_v4 = vsel %vm419_vm2, %v475_v3, 0 }
 0x2b1   : > { %489 = vmatpush.bf16.msrb.mxu2 %v480_v4  ;;  %v987_v4 = vld [vmem:[%s1497_s7 + $0x18] sm:$0xff] }
 0x2b2   : > { %784 = vmatpush.bf16.msra.mxu3 %v987_v4 }
 0x2b5   : > { %601 = vmatpush.bf16.msra.mxu2 %v592_v5  ;;  %v470_v6 = vpop.xlane.xlu0 %469  ;;  %v986_v5 = vld [vmem:[%s1497_s7 + $0x10] sm:$0xff] }
 0x2b6   : > { %1077 = vrcp.f32 %v470_v6  ;;  %785 = vmatpush.bf16.msra.mxu3 %v986_v5  ;;  %v1066_v6 = vld [vmem:[%s1496_s6] ss:$0 sm:$0xff] }
 0x2bc   : > { %v1078_v7 = vpop.eup %1077 }
 0x2bd   : > { %v472_v8 = vmul.f32 %v1078_v7, %v1072_v56  ;;  %v582_v9 = vpop.xlane.xlu0 %581  ;;  %v984_v7 = vld [vmem:[%s1497_s7] sm:$0xff] }
 0x2be   : > { %1079 = vrcp.f32 %v582_v9 }
 0x2bf   : > { %v473_v10 = vpack.c.bf16 %v472_v8, %v472_v8  ;;  %1081 = vrcp.f32 %v526_v0 }
 0x2c0   : > { %1083 = vrcp.f32 %v1243_v43 }
 0x2c1   : > { %933 = vmatmul.msk.bf16.vlgmr.msrb.gmra.mxu2 %vm382_vm1, %v473_v10 }
 0x2c4   : > { %v1080_v11 = vpop.eup %1079 }
 0x2c5   : > { %v584_v12 = vmul.f32 %v1080_v11, %v1074_v58  ;;  %v1082_v13 = vpop.eup %1081 }
 0x2c6   : > { %v528_v14 = vmul.f32 %v1082_v13, %v1070_v52  ;;  %v1084_v44 = vpop.eup %1083 }
 0x2c7   : > { %v585_v15 = vpack.c.bf16 %v584_v12, %v584_v12  ;;  %v663_v45 = vmul.f32 32.0, %v1084_v44  ;;  %vm667_vm5 = vweird.f32 %v1084_v44 }
 0x2c8   : > { %v529_v18 = vpack.c.bf16 %v528_v14, %v528_v14 }
 0x2c9   : > { %v664_v46 = vsub.f32 1.0, %v663_v45 }
 0x2cb   : > { %v665_v47 = vmul.f32 %v1084_v44, %v664_v46 }
 0x2cd   : > { %v666_v49 = vadd.f32 %v1084_v44, %v665_v47 }
 0x2cf   : > { %v1427_v51 = vsel %vm667_vm5, %v1084_v44, %v666_v49 }
 0x2d0   : > { %v531_v16 = vpop.permute.xlu0 %530 }
 0x2d1   : > { %937 = vmatmul.msk.bf16.vlgmr.msra.gmra.mxu2 %vm382_vm1, %v585_v15  ;;  %v536_v17 = vsel %vm419_vm2, %v531_v16, 0 }
 0x2d2   : > { %545 = vmatpush.bf16.msrb.mxu1 %v536_v17 }
 0x2d5   : > { %935 = vmatmul.msk.bf16.vlgmr.msrb.gmra.mxu1 %vm382_vm1, %v529_v18 }
 0x2d6   : > { %715 = vmatpush.bf16.msra.mxu1 %v983_v48 }
 0x2da   : > { %716 = vmatpush.bf16.msra.mxu1 %v982_v50 }
 0x326   : > { %v432_v19 = vpop.f32.mrf.mxu2 }
 0x32e   : > { %v434_v20 = vpop.f32.mrf.mxu2 }
 0x344   : > { %v491_v21 = vpop.f32.mrf.mxu2 }
 0x345   : > { %608 = vrot.lane.b32.xlu1 %v491_v21, %s1240_s26  ;;  %s1167_s26 = sshra.s32 %s830_s25, 4  ;;  %s1168_s26 = int_to_ptr.hbm [resolvable:$true] %s1167_s26 }
 0x346   : > { %p1174_p3 = scmp.lt.s32.totalorder %s1168_s26, %s1498_s8 }
 0x34c   : > { %v493_v22 = vpop.f32.mrf.mxu2 }
 0x352   : > { %v547_v23 = vpop.f32.mrf.mxu1 }
 0x353   : > { %612 = vrot.lane.b32.xlu2 %v547_v23, %s1241_s10  ;;  %s1169_s10 = scalar_lea.hbm %s1168_s26, 8 }
 0x354   : > { %v603_v24 = vpop.f32.mrf.mxu2  ;;  %p1170_p0 = scmp.ne.s32.totalorder %s1168_s26, %s1169_s10  ;;  %p1175_p4 = scmp.lt.s32.totalorder %s1173_s19, %s1169_s10 }
 0x355   : > { %616 = vrot.lane.b32.xlu1 %v603_v24, %s1242_s12 }
 0x356   : > { %p1171_p1 = pnand %p1170_p0, %p1327_p5  ;;  %p1176_p7 = por %p1175_p4, %p1174_p3 }
 0x358   : > { %p1172_p2 = pneg %p1171_p1 }
 0x35a   : > { %v549_v25 = vpop.f32.mrf.mxu1  ;;  %p1177_p8 = pnand %p1176_p7, %p1172_p2 }
 0x35c   : > { %v605_v26 = vpop.f32.mrf.mxu2 }
 0x35d   : > { %v751_v26 = vperm.slane %v1423_v36, 1 }
 0x3ad   : > { %v613_v31 = vpop.permute.xlu2 %612 }
 0x3b7   : > { %v609_v29 = vpop.permute.xlu1 %608 }
 0x3b8   : > { %v619_v30 = vsel %vm382_vm1, %v432_v19, %v609_v29 }
 0x3b9   : > { %v621_v33 = vsel %vm620_vm3, %v619_v30, %v613_v31 }
 0x3c7   : > { %v617_v32 = vpop.permute.xlu1 %616 }
 0x3c8   : > { %v623_v34 = vsel %vm622_vm4, %v621_v33, %v617_v32 }
 0x3c9   : > { %v624_v35 = vpack.c.bf16 %v623_v34, %v623_v34 }
 0x3cb   : > { %946 = vmatmul.msk.bf16.vlgmr.msra.gmra.mxu0 %vm357_vm0, %v624_v35 }
 0x448   : > { %v654_v38 = vpop.f32.mrf.mxu0 }
 0x449   : > { %v655_v39 = vadd.f32 %v654_v38, %v629_v37 }
 0x44b   : > { %v658_v40 = vmul.f32 %v655_v39, %v655_v39 }
 0x44d   : > { %v659_v41 = vsel %vm357_vm0, %v658_v40, 0.0 }
 0x44e   : > { %660 = vadd.xlane.f32.xlu2 %v659_v41 }
 0x450   : > { %v656_v42 = vpop.f32.mrf.mxu0 }
 0x451   : > { %v810_v42 = vperm.slane %v1423_v36, 3 }
 0x4c1   : > { %v661_v52 = vpop.xlane.xlu2 %660 }
 0x4c2   : > { %v669_v53 = vmul.f32 %v1427_v51, %v661_v52 }
 0x4c4   : > { %v670_v54 = vadd.f32 1e-06, %v669_v53 }
 0x4c6   : > { %1085 = vrsqrt.f32 %v670_v54  ;;  %vm677_vm7 = vweird.f32 %v670_v54 }
 0x4cc   : > { %v1086_v55 = vpop.eup %1085 }
 0x4cd   : > { %v672_v56 = vmul.f32 %v1086_v55, %v670_v54  ;;  %vm678_vm6 = vweird.f32 %v1086_v55 }
 0x4ce   : > { %vm679_vm8 = vmor %vm677_vm7, %vm678_vm6 }
 0x4cf   : > { %v673_v57 = vmul.f32 %v1086_v55, %v672_v56 }
 0x4d1   : > { %v674_v58 = vmul.f32 0.5, %v673_v57 }
 0x4d3   : > { %v675_v59 = vsub.f32 1.5, %v674_v58 }
 0x4d5   : > { %v676_v60 = vmul.f32 %v1086_v55, %v675_v59 }
 0x4d7   : > { %v680_v62 = vsel %vm679_vm8, %v1086_v55, %v676_v60 }
 0x4d8   : > { %v681_v63 = vmul.f32 %v680_v62, %v655_v39 }
 0x4da   : > { %v683_v0 = vmul.f32 %v682_v61, %v681_v63 }
 0x4dc   : > { %v1432_v1 = vadd.f32 %v683_v0, %v1373_v2  ;;  %v985_v2 = vld [vmem:[%s1497_s7 + $0x8] sm:$0xff] }
 0x4dd   : > { %786 = vmatpush.bf16.msra.mxu3 %v985_v2 }
 0x4de   : > { %v685_v3 = vpack.c.bf16 %v1432_v1, %v1432_v1 }
 0x4e0   : > { %955 = vmatmul.msk.bf16.vlgmr.msra.gmra.mxu1 %vm357_vm0, %v685_v3 }
 0x4e1   : > { %787 = vmatpush.bf16.msra.mxu3 %v984_v7 }
 0x55d   : > { %v718_v8 = vpop.f32.mrf.mxu1 }
 0x55e   : > { %v719_v9 = vadd.f32 %v1066_v6, %v718_v8 }
 0x560   : > { %v956_v10 = vmul.f32 -1.442695, %v719_v9 }
 0x562   : > { %1087 = vpow2.f32 %v956_v10 }
 0x565   : > { %v720_v11 = vpop.f32.mrf.mxu1 }
 0x568   : > { %v1088_v12 = vpop.eup %1087 }
 0x569   : > { %v725_v13 = vadd.f32 1.0, %v1088_v12 }
 0x56b   : > { %1089 = vrcp.f32 %v725_v13  ;;  %v737_v17 = vand.u32 2147483648, %v725_v13  ;;  %v735_v19 = vand.u32 2147483647, %v725_v13  ;;  %vm731_vm10 = vweird.f32 %v725_v13 }
 0x56d   : > { %v738_v21 = vor.u32 1.1754944e-38, %v737_v17  ;;  %vm736_vm12 = vcmp.eq.f32.partialorder %v735_v19, 8.507059e+37 }
 0x571   : > { %v1090_v14 = vpop.eup %1089 }
 0x572   : > { %v727_v15 = vmul.f32 %v1090_v14, %v725_v13  ;;  %vm732_vm9 = vweird.f32 %v1090_v14 }
 0x573   : > { %vm733_vm11 = vmor %vm731_vm10, %vm732_vm9 }
 0x574   : > { %v728_v16 = vsub.f32 1.0, %v727_v15 }
 0x576   : > { %v729_v18 = vmul.f32 %v1090_v14, %v728_v16 }
 0x578   : > { %v730_v20 = vadd.f32 %v1090_v14, %v729_v18 }
 0x57a   : > { %v734_v22 = vsel %vm733_vm11, %v1090_v14, %v730_v20 }
 0x57b   : > { %v739_v23 = vsel %vm736_vm12, %v738_v21, %v734_v22 }
 0x57c   : > { %v741_v24 = vmul.f32 %v739_v23, %v719_v9 }
 0x57e   : > { %v742_v25 = vpack.c.bf16 %v741_v24, %v741_v24 }
 0x580   : > { %973 = vmatmul.msk.bf16.vlgmr.msra.gmra.mxu3 %vm776_vm13, %v742_v25 }
 0x603   : > { %v789_v27 = vpop.f32.mrf.mxu3 }
 0x604   : > { %v790_v28 = vadd.f32 %v789_v27, %v751_v26 }
 0x606   : > { %v793_v29 = vmul.f32 %v790_v28, %v790_v28 }
 0x608   : > { %v794_v30 = vsel %vm357_vm0, %v793_v29, 0.0 }
 0x609   : > { %795 = vadd.xlane.f32.xlu1 %v794_v30 }
 0x60b   : > { %v791_v31 = vpop.f32.mrf.mxu3 }
 0x67c   : > { %v796_v32 = vpop.xlane.xlu1 %795 }
 0x67d   : > { %v797_v33 = vmul.f32 %v796_v32, %v1427_v51 }
 0x67f   : > { %v798_v34 = vadd.f32 1e-06, %v797_v33 }
 0x681   : > { %1091 = vrsqrt.f32 %v798_v34  ;;  %vm805_vm15 = vweird.f32 %v798_v34 }
 0x687   : > { %v1092_v35 = vpop.eup %1091 }
 0x688   : > { %v800_v37 = vmul.f32 %v1092_v35, %v798_v34  ;;  %vm806_vm14 = vweird.f32 %v1092_v35 }
 0x689   : > { %vm807_vm1 = vmor %vm805_vm15, %vm806_vm14 }
 0x68a   : > { %v801_v38 = vmul.f32 %v1092_v35, %v800_v37 }
 0x68c   : > { %v802_v39 = vmul.f32 0.5, %v801_v38 }
 0x68e   : > { %v803_v40 = vsub.f32 1.5, %v802_v39 }
 0x690   : > { %v804_v41 = vmul.f32 %v1092_v35, %v803_v40 }
 0x692   : > { %v808_v43 = vsel %vm807_vm1, %v1092_v35, %v804_v41 }
 0x693   : > { %v809_v44 = vmul.f32 %v808_v43, %v790_v28 }
 0x695   : > { %v811_v45 = vmul.f32 %v810_v42, %v809_v44 }
 0x697   : > { %v812_v46 = vadd.f32 %v811_v45, %v1432_v1 }
 0x699   : > { %813 = vst.msk [vmem:[%s328_s23] sm:$0xff] %vm357_vm0, %v812_v46 }
 0x69a   : > { %1180 = shalt.err (!%p1177_p8)
}
 0x69b   : > { %996 = dma.vmem_to_hbm [thread:$0]  (%p1327_p5), %s828_s24, 128, %s830_s25, %s815_s9  }
 0x69c PF: > { %p1013_p9 = scmp.ge.s32.totalorder %s1223_s30, 2  ;;  %s841_s18 = sand.u32 1, %s1211_s27  }
 0x69d   : > { %s842_s21 = scalar_lea.sflag [#allocation4], %s841_s18 }
 0x69e   : > { %p1006_p10 = pnand %p1013_p9, %p1331_p6 }
 0x6a0   : > { %p1007_p11 = pneg %p1006_p10 }
 0x6a2   : > { %1206 = dma.done.wait (%p1007_p11), %s842_s21, 128  }
 0x6a3   : > { %1208 = vsyncadd (%p1007_p11), %s842_s21, 4294967168  ;;  %p20_p12 = scmp.ge.s32.totalorder %s1314_s11, 4   ;;  %s1502_s27 = smov %s1215_s28 }
 0x6a4   : > { %s1503_s28 = smov %s1219_s29  ;;  %s1504_s29 = smov %s1325_s14 }
 0x6a5   : > { %s1505_s30 = smov %s1314_s11  ;;  %22 = sbr.rel (!%p20_p12) target bundleno = 5 (0x5), region = 96 }
 0x6aa   :  { %848 = vsyncpa [#allocation3], 1 }
 0x6ab   :  { %850 = vsyncpa [#allocation3 + $0x1], 1 }
 0x6ac   :  { %851 = vsyncpa [#allocation6], 1 }
 0x6ad   :  { %852 = vsyncpa [#allocation4], 1 }
 0x6ae   :  { %854 = vsyncpa [#allocation4 + $0x1], 1 }

</bundles_post_ra>
